<compile_context>
chip_gen: v7x
topology: tpu7x:2x2x1
jax: 0.10.0
libtpu: 0.0.40
codegen_flags: <defaults>
</compile_context>

<pallas_src>
import functools

import jax
import jax.numpy as jnp
from jax import lax
from jax.experimental import pallas as pl
from jax.experimental.pallas import tpu as pltpu


def _round_up(x, m):
    return ((x + m - 1) // m) * m


# ----------------------------------------------------------------------------
# Pallas kernel: one bidirectional LSTM layer (+ optional fused fc epilogue)
# ----------------------------------------------------------------------------
def _bilstm_layer_kernel(x_ref, wih_ref, b_ref, whh_ref, *rest,
                         seq_len, batch, hidden, fuse_fc, unroll):
    if fuse_fc:
        wfc_ref, bfc_ref, out_ref, gx_f_sc, gx_b_sc, hs_sc = rest
    else:
        out_ref, gx_f_sc, gx_b_sc = rest

    T, B, H = seq_len, batch, hidden          # B is already sublane-padded (%8==0)
    G = 4 * H                                  # per-direction gate width

    # ---- Prologue: hoisted input projection, one matmul for BOTH directions.
    # gx = x @ [Wih_f^T | Wih_b^T] + [b_f | b_b]   -> (T*B, 8H)
    gx = jnp.dot(x_ref[...], wih_ref[...],
                 preferred_element_type=jnp.float32) + b_ref[...]
    gx_f_sc[...] = gx[:, :G]                   # vreg-aligned lane split
    gx_b_sc[...] = gx[:, G:]

    if not fuse_fc:
        # Lane-dense padded output: zero the pad lanes once; the loop fills
        # [:, :2H] directly (no separate hidden-state scratch on this path).
        out_ref[...] = jnp.zeros(out_ref.shape, out_ref.dtype)

    # Hoist loop-invariants out of the recurrence.
    whh = whh_ref[...]                         # (2H, 8H) block-diagonal
    lane = lax.broadcasted_iota(jnp.int32, (B, 2 * G), 1)
    lane4 = lane % G
    is_g = (lane4 >= 2 * H) & (lane4 < 3 * H)  # tanh lanes (PyTorch gate order i,f,g,o)

    def cell(act, c_prev):
        # act: (B, 4H) = [sig(i) | sig(f) | tanh(g) | sig(o)].
        # XLU rolls bring each gate to lanes [0, H) so every extract is an
        # offset-0 slice (no lane-offset relayout on the serial path).
        sig_i = act[:, :H]
        sig_f = pltpu.roll(act, shift=3 * H, axis=1)[:, :H]
        tan_g = pltpu.roll(act, shift=2 * H, axis=1)[:, :H]
        sig_o = pltpu.roll(act, shift=1 * H, axis=1)[:, :H]
        c_new = sig_f * c_prev + sig_i * tan_g
        h_new = sig_o * jnp.tanh(c_new)
        return h_new, c_new

    def step(t, carry):
        h_cat, c_f, c_b = carry
        off_f = pl.multiple_of(t * B, B)                 # fwd reads time t
        off_b = pl.multiple_of((T - 1 - t) * B, B)       # bwd reads time T-1-t

        # ONE recurrent MXU push per step for both directions (block-diag Whh).
        gh = jnp.dot(h_cat, whh, preferred_element_type=jnp.float32)  # (B, 8H)
        gxt = jnp.concatenate(
            [gx_f_sc[pl.ds(off_f, B), :], gx_b_sc[pl.ds(off_b, B), :]], axis=1)
        g_all = gxt + gh

        # One sigmoid + one tanh EUP push over the full gate value, lane-select.
        act = jnp.where(is_g, jnp.tanh(g_all), jax.nn.sigmoid(g_all))

        h_f, c_f = cell(act[:, :G], c_f)
        h_b, c_b = cell(act[:, G:], c_b)

        if fuse_fc:
            hs_sc[pl.ds(off_f, B), :H] = h_f
            hs_sc[pl.ds(off_b, B), H:] = h_b
        else:
            out_ref[pl.ds(off_f, B), :H] = h_f
            out_ref[pl.ds(off_b, B), H:2 * H] = h_b

        return jnp.concatenate([h_f, h_b], axis=1), c_f, c_b

    zeros_h = jnp.zeros((B, H), jnp.float32)
    carry0 = (jnp.zeros((B, 2 * H), jnp.float32), zeros_h, zeros_h)

    # ---- Partial unroll: fori_loop over chunks with a statically unrolled
    # inner body -> static intra-chunk offsets + bounded vreg live ranges,
    # while keeping the two direction chains visible to the LLO scheduler.
    U = max(1, min(unroll, T))
    while T % U:
        U -= 1

    def chunk(ci, carry):
        for j in range(U):
            carry = step(ci * U + j, carry)
        return carry

    lax.fori_loop(0, T // U, chunk, carry0)

    # ---- Epilogue: fused nn.Linear on the VMEM-resident hidden states.
    if fuse_fc:
        out_ref[...] = (
            jnp.dot(hs_sc[...], wfc_ref[...], preferred_element_type=jnp.float32)
            + bfc_ref[...]
        ).astype(out_ref.dtype)


# ----------------------------------------------------------------------------
# One-time parameter preprocessing (hoisted out of the forward path)
# ----------------------------------------------------------------------------
def preprocess_params(params, hidden_dim):
    H = hidden_dim
    O = params["fc_w"].shape[0]
    O_pad = max(_round_up(O, 128), 128)              # lane-dense final output
    inter_pad = max(_round_up(2 * H, 128), 128)      # lane-dense intermediate output

    layers = []
    for l, layer in enumerate(params["lstm"]):
        fwd, bwd = layer["fwd"], layer["bwd"]
        in_dim = fwd["w_ih"].shape[1]
        d_pad = in_dim if l == 0 else inter_pad      # carry pad lanes into Wih rows
        wih_cat = jnp.concatenate(
            [jnp.transpose(fwd["w_ih"]), jnp.transpose(bwd["w_ih"])], axis=1)
        if d_pad > in_dim:
            wih_cat = jnp.pad(wih_cat, ((0, d_pad - in_dim), (0, 0)))
        b_cat = jnp.concatenate(
            [fwd["b_ih"] + fwd["b_hh"], bwd["b_ih"] + bwd["b_hh"]]).reshape(1, 8 * H)
        whh_big = jnp.zeros((2 * H, 8 * H), jnp.float32)
        whh_big = whh_big.at[:H, :4 * H].set(jnp.transpose(fwd["w_hh"]))
        whh_big = whh_big.at[H:, 4 * H:].set(jnp.transpose(bwd["w_hh"]))
        layers.append(dict(wih_cat=wih_cat, b_cat=b_cat, whh_big=whh_big))

    wfc = jnp.zeros((2 * H, O_pad), jnp.float32).at[:, :O].set(
        jnp.transpose(params["fc_w"]))
    bfc = jnp.zeros((1, O_pad), jnp.float32).at[:, :O].set(params["fc_b"])
    return dict(embedding=params["embedding"], layers=layers, wfc=wfc, bfc=bfc,
                hidden=H, out_dim=O, out_pad=O_pad, inter_pad=inter_pad)


# ----------------------------------------------------------------------------
# Wrappers
# ----------------------------------------------------------------------------
def _layer_vmem_bytes(T, Bp, D, H, out_cols, fuse_fc):
    f32 = 4
    io = (T * Bp * D + D * 8 * H + 8 * H + 2 * H * 8 * H + T * Bp * out_cols) * f32
    if fuse_fc:
        io += (2 * H * out_cols + out_cols) * f32
    scratch = (2 * T * Bp * 4 * H + (T * Bp * 2 * H if fuse_fc else 0)) * f32
    # headroom for Pallas-managed in/out buffering; clamp to v7x-safe 64 MiB.
    return int(min(max(2 * io + scratch + (4 << 20), 8 << 20), 64 << 20))


def bilstm_layer_pallas(x, layer_w, hidden_dim, fc=None, unroll=4):
    """One bidirectional LSTM layer (optionally with the final fc fused) as a
    single gridless Pallas kernel. x: (T, B_pad, D) with B_pad % 8 == 0."""
    T, Bp, D = x.shape
    H = hidden_dim
    assert Bp % 8 == 0
    fuse_fc = fc is not None

    x2d = x.reshape(T * Bp, D).astype(jnp.float32)
    args = [x2d, layer_w["wih_cat"], layer_w["b_cat"], layer_w["whh_big"]]
    if fuse_fc:
        wfc, bfc = fc
        out_cols = wfc.shape[1]                       # already 128-padded
        args += [wfc, bfc]
    else:
        out_cols = max(_round_up(2 * H, 128), 128)    # lane-dense intermediate

    scratch = [
        pltpu.VMEM((T * Bp, 4 * H), jnp.float32),     # gx fwd
        pltpu.VMEM((T * Bp, 4 * H), jnp.float32),     # gx bwd
    ]
    if fuse_fc:
        scratch.append(pltpu.VMEM((T * Bp, 2 * H), jnp.float32))   # hidden states

    # TODO(synk): for v7x production sizes, split the (padded) batch across the
    #   2 TensorCores (batch grid axis / pl.core_map) and time-chunk the gx
    #   prologue via pltpu.emit_pipeline to respect the 64 MiB VMEM; on v6e
    #   store gx as bf16 (f32 accumulation) when VMEM-limited.
    kernel = functools.partial(_bilstm_layer_kernel, seq_len=T, batch=Bp,
                               hidden=H, fuse_fc=fuse_fc, unroll=unroll)
    out2d = pl.pallas_call(
        kernel,
        out_shape=jax.ShapeDtypeStruct((T * Bp, out_cols), jnp.float32),
        scratch_shapes=scratch,
        compiler_params=pltpu.CompilerParams(
            vmem_limit_bytes=_layer_vmem_bytes(T, Bp, D, H, out_cols, fuse_fc)),
    )(*args)
    return out2d.reshape(T, Bp, out_cols)


def bilstm_forward(prep, tokens, unroll=4):
    """tokens: (T, B) int32 -> logits (T, B, output_dim)."""
    T, B = tokens.shape
    H = prep["hidden"]
    # Embedding lookup (data-dependent gather) stays in plain JAX; the whole
    # hot path runs in one fused Pallas kernel per layer.
    x = jnp.take(prep["embedding"], tokens, axis=0)        # (T, B, E)
    # emb_dropout / lstm_dropout / fc_dropout: identity at inference.
    Bp = _round_up(B, 8)                                    # sublane-pad batch once
    if Bp > B:
        x = jnp.pad(x, ((0, 0), (0, Bp - B), (0, 0)))
    n_layers = len(prep["layers"])
    for li, lw in enumerate(prep["layers"]):
        fc = (prep["wfc"], prep["bfc"]) if li == n_layers - 1 else None
        x = bilstm_layer_pallas(x, lw, H, fc=fc, unroll=unroll)
    return x[:, :B, :prep["out_dim"]]                       # strip batch/lane pad


# ----------------------------------------------------------------------------
# Pure-JAX reference (for correctness check)
# ----------------------------------------------------------------------------
def _lstm_dir_ref(x, w_ih, w_hh, b_ih, b_hh, reverse):
    T, B, _ = x.shape
    H = w_hh.shape[1]
    b = b_ih + b_hh
    xs = x[::-1] if reverse else x

    def step(carry, x_t):
        h, c = carry
        gates = x_t @ w_ih.T + h @ w_hh.T + b
        i, f, g, o = jnp.split(gates, 4, axis=-1)
        i = jax.nn.sigmoid(i)
        f = jax.nn.sigmoid(f)
        g = jnp.tanh(g)
        o = jax.nn.sigmoid(o)
        c = f * c + i * g
        h = o * jnp.tanh(c)
        return (h, c), h

    init = (jnp.zeros((B, H), jnp.float32), jnp.zeros((B, H), jnp.float32))
    _, hs = jax.lax.scan(step, init, xs)
    return hs[::-1] if reverse else hs


def bilstm_ref(params, tokens):
    x = jnp.take(params["embedding"], tokens, axis=0)
    for layer in params["lstm"]:
        h_f = _lstm_dir_ref(x, reverse=False, **layer["fwd"])
        h_b = _lstm_dir_ref(x, reverse=True, **layer["bwd"])
        x = jnp.concatenate([h_f, h_b], axis=-1)
    return x @ params["fc_w"].T + params["fc_b"]


# ----------------------------------------------------------------------------
# Deterministic parameter init (mimics init_weights: N(0, 0.1); init_embeddings)
# ----------------------------------------------------------------------------
def init_params(key, input_dim, embedding_dim, hidden_dim, output_dim,
                lstm_layers, word_pad_idx):
    def normal(k, shape):
        return 0.1 * jax.random.normal(k, shape, dtype=jnp.float32)

    keys = jax.random.split(key, 3 + lstm_layers)
    emb = normal(keys[0], (input_dim, embedding_dim))
    emb = emb.at[word_pad_idx].set(0.0)            # init_embeddings(word_pad_idx)

    lstm = []
    for l in range(lstm_layers):
        in_dim = embedding_dim if l == 0 else 2 * hidden_dim
        ks = jax.random.split(keys[3 + l], 8)

        def dir_params(kk):
            return dict(
                w_ih=normal(kk[0], (4 * hidden_dim, in_dim)),
                w_hh=normal(kk[1], (4 * hidden_dim, hidden_dim)),
                b_ih=normal(kk[2], (4 * hidden_dim,)),
                b_hh=normal(kk[3], (4 * hidden_dim,)),
            )

        lstm.append(dict(fwd=dir_params(ks[:4]), bwd=dir_params(ks[4:])))

    fc_w = normal(keys[1], (output_dim, 2 * hidden_dim))
    fc_b = normal(keys[2], (output_dim,))
    return dict(embedding=emb, lstm=lstm, fc_w=fc_w, fc_b=fc_b)


# ----------------------------------------------------------------------------
if __name__ == "__main__":
    # Hyperparameters (small but consistent with the module's forward()).
    input_dim = 50        # vocab size
    embedding_dim = 16
    hidden_dim = 32
    output_dim = 8
    lstm_layers = 1
    word_pad_idx = 0
    seq_len, batch = 8, 2

    key = jax.random.PRNGKey(0)
    pkey, tkey = jax.random.split(key)
    params = init_params(pkey, input_dim, embedding_dim, hidden_dim, output_dim,
                         lstm_layers, word_pad_idx)
    tokens = jax.random.randint(tkey, (seq_len, batch), 0, input_dim,
                                dtype=jnp.int32)

    prep = preprocess_params(params, hidden_dim)   # one-time weight prep
    out = bilstm_forward(prep, tokens, unroll=4)
    out = jax.block_until_ready(out)

    assert out.shape == (seq_len, batch, output_dim), out.shape

    ref = jax.block_until_ready(bilstm_ref(params, tokens))
    assert jnp.allclose(out, ref, atol=1e-3, rtol=1e-3), \
        float(jnp.max(jnp.abs(out - ref)))

    print("KERNEL_OK")
</pallas_src>

<mosaic_0001>
module attributes {stable_mosaic.version = 11 : i64} {
  func.func @_bilstm_layer_kernel(%arg0: memref<64x16xf32, #tpu.memory_space<vmem>>, %arg1: memref<16x256xf32, #tpu.memory_space<vmem>>, %arg2: memref<1x256xf32, #tpu.memory_space<vmem>>, %arg3: memref<64x256xf32, #tpu.memory_space<vmem>>, %arg4: memref<64x128xf32, #tpu.memory_space<vmem>>, %arg5: memref<1x128xf32, #tpu.memory_space<vmem>>, %arg6: memref<64x128xf32, #tpu.memory_space<vmem>>, %arg7: memref<64x128xf32, #tpu.memory_space<vmem>>, %arg8: memref<64x128xf32, #tpu.memory_space<vmem>>, %arg9: memref<64x64xf32, #tpu.memory_space<vmem>>) attributes {dimension_semantics = [], scalar_prefetch = 0 : i64, scratch_operands = 3 : i64, tpu.core_type = #tpu.core_type<tc>} {
    %c0 = arith.constant 0 : index
    %c0_0 = arith.constant 0 : index
    %0 = vector.load %arg0[%c0, %c0_0] : memref<64x16xf32, #tpu.memory_space<vmem>>, vector<64x16xf32>
    %c0_1 = arith.constant 0 : index
    %c0_2 = arith.constant 0 : index
    %1 = vector.load %arg1[%c0_1, %c0_2] : memref<16x256xf32, #tpu.memory_space<vmem>>, vector<16x256xf32>
    %cst = arith.constant dense<0.000000e+00> : vector<64x256xf32>
    %2 = tpu.matmul %0, %1, %cst {dimension_numbers = #tpu.dot_dimension_numbers<[1], [0], [0], [1], [0, 0, 1, 1], [], []>} : vector<64x16xf32>, vector<16x256xf32>, vector<64x256xf32> -> vector<64x256xf32>
    %c0_3 = arith.constant 0 : index
    %c0_4 = arith.constant 0 : index
    %3 = vector.load %arg2[%c0_3, %c0_4] : memref<1x256xf32, #tpu.memory_space<vmem>>, vector<1x256xf32>
    %4 = vector.broadcast %3 : vector<1x256xf32> to vector<64x256xf32>
    %5 = arith.addf %2, %4 : vector<64x256xf32>
    %6 = vector.extract_strided_slice %5 {offsets = [0, 0], sizes = [64, 128], strides = [1, 1]} : vector<64x256xf32> to vector<64x128xf32>
    %c0_5 = arith.constant 0 : index
    %c0_6 = arith.constant 0 : index
    %7 = vector.load %arg7[%c0_5, %c0_6] : memref<64x128xf32, #tpu.memory_space<vmem>>, vector<64x128xf32>
    tpu.vector_store %arg7[%c0_5, %c0_6], %6 {strides = array<i32>} : memref<64x128xf32, #tpu.memory_space<vmem>>, vector<64x128xf32>,
    %8 = vector.extract_strided_slice %5 {offsets = [0, 128], sizes = [64, 128], strides = [1, 1]} : vector<64x256xf32> to vector<64x128xf32>
    %c0_7 = arith.constant 0 : index
    %c0_8 = arith.constant 0 : index
    %9 = vector.load %arg8[%c0_7, %c0_8] : memref<64x128xf32, #tpu.memory_space<vmem>>, vector<64x128xf32>
    tpu.vector_store %arg8[%c0_7, %c0_8], %8 {strides = array<i32>} : memref<64x128xf32, #tpu.memory_space<vmem>>, vector<64x128xf32>,
    %c0_9 = arith.constant 0 : index
    %c0_10 = arith.constant 0 : index
    %10 = vector.load %arg3[%c0_9, %c0_10] : memref<64x256xf32, #tpu.memory_space<vmem>>, vector<64x256xf32>
    %11 = tpu.iota {dimensions = array<i32: 1>} : vector<8x256xi32>
    %c128_i32 = arith.constant 128 : i32
    %c0_i32 = arith.constant 0 : i32
    %12 = arith.cmpi eq, %c128_i32, %c0_i32 : i32
    %c1_i32 = arith.constant 1 : i32
    %13 = arith.select %12, %c1_i32, %c128_i32 : i32
    %14 = vector.broadcast %13 : i32 to vector<8x256xi32>
    %15 = arith.remsi %11, %14 : vector<8x256xi32>
    %c0_i32_11 = arith.constant 0 : i32
    %16 = vector.broadcast %c0_i32_11 : i32 to vector<8x256xi32>
    %17 = arith.cmpi ne, %15, %16 : vector<8x256xi32>
    %c0_i32_12 = arith.constant 0 : i32
    %18 = vector.broadcast %c0_i32_12 : i32 to vector<8x256xi32>
    %19 = arith.cmpi slt, %15, %18 : vector<8x256xi32>
    %c0_i32_13 = arith.constant 0 : i32
    %20 = arith.cmpi slt, %13, %c0_i32_13 : i32
    %21 = vector.broadcast %20 : i1 to vector<8x256xi1>
    %22 = vector.broadcast %21 : vector<8x256xi1> to vector<8x256xi1>
    %23 = arith.xori %19, %22 : vector<8x256xi1>
    %24 = arith.andi %23, %17 : vector<8x256xi1>
    %25 = vector.broadcast %13 : i32 to vector<8x256xi32>
    %26 = arith.addi %15, %25 : vector<8x256xi32>
    %27 = arith.select %24, %26, %15 : vector<8x256xi1>, vector<8x256xi32>
    %c64_i32 = arith.constant 64 : i32
    %28 = vector.broadcast %c64_i32 : i32 to vector<8x256xi32>
    %29 = arith.cmpi sge, %27, %28 : vector<8x256xi32>
    %c96_i32 = arith.constant 96 : i32
    %30 = vector.broadcast %c96_i32 : i32 to vector<8x256xi32>
    %31 = arith.cmpi slt, %27, %30 : vector<8x256xi32>
    %32 = arith.andi %29, %31 : vector<8x256xi1>
    %cst_14 = arith.constant 0.000000e+00 : f32
    %33 = vector.broadcast %cst_14 : f32 to vector<8x32xf32>
    %cst_15 = arith.constant 0.000000e+00 : f32
    %34 = vector.broadcast %cst_15 : f32 to vector<8x64xf32>
    %c0_i32_16 = arith.constant 0 : i32
    %c2_i32 = arith.constant 2 : i32
    %35 = arith.addi %c0_i32_16, %c2_i32 : i32
    %c1_i32_17 = arith.constant 1 : i32
    %36:3 = scf.for %arg10 = %c0_i32_16 to %35 step %c1_i32_17 iter_args(%arg11 = %34, %arg12 = %33, %arg13 = %33) -> (vector<8x64xf32>, vector<8x32xf32>, vector<8x32xf32>)  : i32 {
      %c4_i32 = arith.constant 4 : i32
      %44 = arith.muli %arg10, %c4_i32 : i32
      %c0_i32_28 = arith.constant 0 : i32
      %45 = arith.addi %44, %c0_i32_28 : i32
      %c8_i32 = arith.constant 8 : i32
      %46 = arith.muli %45, %c8_i32 : i32
      %47 = tpu.assume_multiple %46, 8 : i32
      %c7_i32 = arith.constant 7 : i32
      %48 = arith.subi %c7_i32, %45 : i32
      %c8_i32_29 = arith.constant 8 : i32
      %49 = arith.muli %48, %c8_i32_29 : i32
      %50 = tpu.assume_multiple %49, 8 : i32
      %cst_30 = arith.constant dense<0.000000e+00> : vector<8x256xf32>
      %51 = tpu.matmul %arg11, %10, %cst_30 {dimension_numbers = #tpu.dot_dimension_numbers<[1], [0], [0], [1], [0, 0, 1, 1], [], []>} : vector<8x64xf32>, vector<64x256xf32>, vector<8x256xf32> -> vector<8x256xf32>
      %52 = arith.index_cast %47 : i32 to index
      %c0_31 = arith.constant 0 : index
      %53 = vector.load %arg7[%52, %c0_31] : memref<64x128xf32, #tpu.memory_space<vmem>>, vector<8x128xf32>
      %54 = arith.index_cast %50 : i32 to index
      %c0_32 = arith.constant 0 : index
      %55 = vector.load %arg8[%54, %c0_32] : memref<64x128xf32, #tpu.memory_space<vmem>>, vector<8x128xf32>
      %56 = tpu.concatenate %53, %55 in 1 : vector<8x128xf32>, vector<8x128xf32> -> vector<8x256xf32>
      %57 = arith.addf %56, %51 : vector<8x256xf32>
      %58 = math.tanh %57 : vector<8x256xf32>
      %59 = arith.negf %57 : vector<8x256xf32>
      %60 = math.exp %59 : vector<8x256xf32>
      %cst_33 = arith.constant 1.000000e+00 : f32
      %61 = vector.broadcast %cst_33 : f32 to vector<8x256xf32>
      %62 = arith.addf %61, %60 : vector<8x256xf32>
      %63 = arith.divf %61, %62 : vector<8x256xf32>
      %64 = arith.select %32, %58, %63 : vector<8x256xi1>, vector<8x256xf32>
      %65 = vector.extract_strided_slice %64 {offsets = [0, 0], sizes = [8, 128], strides = [1, 1]} : vector<8x256xf32> to vector<8x128xf32>
      %66 = vector.extract_strided_slice %65 {offsets = [0, 0], sizes = [8, 32], strides = [1, 1]} : vector<8x128xf32> to vector<8x32xf32>
      %c96_i32_34 = arith.constant 96 : i32
      %67 = tpu.dynamic_rotate %65 by %c96_i32_34 dim 1 : vector<8x128xf32>, i32 -> vector<8x128xf32>
      %68 = vector.extract_strided_slice %67 {offsets = [0, 0], sizes = [8, 32], strides = [1, 1]} : vector<8x128xf32> to vector<8x32xf32>
      %c64_i32_35 = arith.constant 64 : i32
      %69 = tpu.dynamic_rotate %65 by %c64_i32_35 dim 1 : vector<8x128xf32>, i32 -> vector<8x128xf32>
      %70 = vector.extract_strided_slice %69 {offsets = [0, 0], sizes = [8, 32], strides = [1, 1]} : vector<8x128xf32> to vector<8x32xf32>
      %c32_i32 = arith.constant 32 : i32
      %71 = tpu.dynamic_rotate %65 by %c32_i32 dim 1 : vector<8x128xf32>, i32 -> vector<8x128xf32>
      %72 = vector.extract_strided_slice %71 {offsets = [0, 0], sizes = [8, 32], strides = [1, 1]} : vector<8x128xf32> to vector<8x32xf32>
      %73 = arith.mulf %68, %arg12 : vector<8x32xf32>
      %74 = arith.mulf %66, %70 : vector<8x32xf32>
      %75 = arith.addf %73, %74 : vector<8x32xf32>
      %76 = math.tanh %75 : vector<8x32xf32>
      %77 = arith.mulf %72, %76 : vector<8x32xf32>
      %78 = vector.extract_strided_slice %64 {offsets = [0, 128], sizes = [8, 128], strides = [1, 1]} : vector<8x256xf32> to vector<8x128xf32>
      %79 = vector.extract_strided_slice %78 {offsets = [0, 0], sizes = [8, 32], strides = [1, 1]} : vector<8x128xf32> to vector<8x32xf32>
      %c96_i32_36 = arith.constant 96 : i32
      %80 = tpu.dynamic_rotate %78 by %c96_i32_36 dim 1 : vector<8x128xf32>, i32 -> vector<8x128xf32>
      %81 = vector.extract_strided_slice %80 {offsets = [0, 0], sizes = [8, 32], strides = [1, 1]} : vector<8x128xf32> to vector<8x32xf32>
      %c64_i32_37 = arith.constant 64 : i32
      %82 = tpu.dynamic_rotate %78 by %c64_i32_37 dim 1 : vector<8x128xf32>, i32 -> vector<8x128xf32>
      %83 = vector.extract_strided_slice %82 {offsets = [0, 0], sizes = [8, 32], strides = [1, 1]} : vector<8x128xf32> to vector<8x32xf32>
      %c32_i32_38 = arith.constant 32 : i32
      %84 = tpu.dynamic_rotate %78 by %c32_i32_38 dim 1 : vector<8x128xf32>, i32 -> vector<8x128xf32>
      %85 = vector.extract_strided_slice %84 {offsets = [0, 0], sizes = [8, 32], strides = [1, 1]} : vector<8x128xf32> to vector<8x32xf32>
      %86 = arith.mulf %81, %arg13 : vector<8x32xf32>
      %87 = arith.mulf %79, %83 : vector<8x32xf32>
      %88 = arith.addf %86, %87 : vector<8x32xf32>
      %89 = math.tanh %88 : vector<8x32xf32>
      %90 = arith.mulf %85, %89 : vector<8x32xf32>
      %91 = arith.index_cast %47 : i32 to index
      %c0_39 = arith.constant 0 : index
      %92 = vector.load %arg9[%91, %c0_39] : memref<64x64xf32, #tpu.memory_space<vmem>>, vector<8x32xf32>
      tpu.vector_store %arg9[%91, %c0_39], %77 {strides = array<i32>} : memref<64x64xf32, #tpu.memory_space<vmem>>, vector<8x32xf32>,
      %93 = arith.index_cast %50 : i32 to index
      %c32 = arith.constant 32 : index
      %94 = vector.load %arg9[%93, %c32] : memref<64x64xf32, #tpu.memory_space<vmem>>, vector<8x32xf32>
      tpu.vector_store %arg9[%93, %c32], %90 {strides = array<i32>} : memref<64x64xf32, #tpu.memory_space<vmem>>, vector<8x32xf32>,
      %95 = tpu.concatenate %77, %90 in 1 : vector<8x32xf32>, vector<8x32xf32> -> vector<8x64xf32>
      %c4_i32_40 = arith.constant 4 : i32
      %96 = arith.muli %arg10, %c4_i32_40 : i32
      %c1_i32_41 = arith.constant 1 : i32
      %97 = arith.addi %96, %c1_i32_41 : i32
      %c8_i32_42 = arith.constant 8 : i32
      %98 = arith.muli %97, %c8_i32_42 : i32
      %99 = tpu.assume_multiple %98, 8 : i32
      %c7_i32_43 = arith.constant 7 : i32
      %100 = arith.subi %c7_i32_43, %97 : i32
      %c8_i32_44 = arith.constant 8 : i32
      %101 = arith.muli %100, %c8_i32_44 : i32
      %102 = tpu.assume_multiple %101, 8 : i32
      %cst_45 = arith.constant dense<0.000000e+00> : vector<8x256xf32>
      %103 = tpu.matmul %95, %10, %cst_45 {dimension_numbers = #tpu.dot_dimension_numbers<[1], [0], [0], [1], [0, 0, 1, 1], [], []>} : vector<8x64xf32>, vector<64x256xf32>, vector<8x256xf32> -> vector<8x256xf32>
      %104 = arith.index_cast %99 : i32 to index
      %c0_46 = arith.constant 0 : index
      %105 = vector.load %arg7[%104, %c0_46] : memref<64x128xf32, #tpu.memory_space<vmem>>, vector<8x128xf32>
      %106 = arith.index_cast %102 : i32 to index
      %c0_47 = arith.constant 0 : index
      %107 = vector.load %arg8[%106, %c0_47] : memref<64x128xf32, #tpu.memory_space<vmem>>, vector<8x128xf32>
      %108 = tpu.concatenate %105, %107 in 1 : vector<8x128xf32>, vector<8x128xf32> -> vector<8x256xf32>
      %109 = arith.addf %108, %103 : vector<8x256xf32>
      %110 = math.tanh %109 : vector<8x256xf32>
      %111 = arith.negf %109 : vector<8x256xf32>
      %112 = math.exp %111 : vector<8x256xf32>
      %cst_48 = arith.constant 1.000000e+00 : f32
      %113 = vector.broadcast %cst_48 : f32 to vector<8x256xf32>
      %114 = arith.addf %113, %112 : vector<8x256xf32>
      %115 = arith.divf %113, %114 : vector<8x256xf32>
      %116 = arith.select %32, %110, %115 : vector<8x256xi1>, vector<8x256xf32>
      %117 = vector.extract_strided_slice %116 {offsets = [0, 0], sizes = [8, 128], strides = [1, 1]} : vector<8x256xf32> to vector<8x128xf32>
      %118 = vector.extract_strided_slice %117 {offsets = [0, 0], sizes = [8, 32], strides = [1, 1]} : vector<8x128xf32> to vector<8x32xf32>
      %c96_i32_49 = arith.constant 96 : i32
      %119 = tpu.dynamic_rotate %117 by %c96_i32_49 dim 1 : vector<8x128xf32>, i32 -> vector<8x128xf32>
      %120 = vector.extract_strided_slice %119 {offsets = [0, 0], sizes = [8, 32], strides = [1, 1]} : vector<8x128xf32> to vector<8x32xf32>
      %c64_i32_50 = arith.constant 64 : i32
      %121 = tpu.dynamic_rotate %117 by %c64_i32_50 dim 1 : vector<8x128xf32>, i32 -> vector<8x128xf32>
      %122 = vector.extract_strided_slice %121 {offsets = [0, 0], sizes = [8, 32], strides = [1, 1]} : vector<8x128xf32> to vector<8x32xf32>
      %c32_i32_51 = arith.constant 32 : i32
      %123 = tpu.dynamic_rotate %117 by %c32_i32_51 dim 1 : vector<8x128xf32>, i32 -> vector<8x128xf32>
      %124 = vector.extract_strided_slice %123 {offsets = [0, 0], sizes = [8, 32], strides = [1, 1]} : vector<8x128xf32> to vector<8x32xf32>
      %125 = arith.mulf %120, %75 : vector<8x32xf32>
      %126 = arith.mulf %118, %122 : vector<8x32xf32>
      %127 = arith.addf %125, %126 : vector<8x32xf32>
      %128 = math.tanh %127 : vector<8x32xf32>
      %129 = arith.mulf %124, %128 : vector<8x32xf32>
      %130 = vector.extract_strided_slice %116 {offsets = [0, 128], sizes = [8, 128], strides = [1, 1]} : vector<8x256xf32> to vector<8x128xf32>
      %131 = vector.extract_strided_slice %130 {offsets = [0, 0], sizes = [8, 32], strides = [1, 1]} : vector<8x128xf32> to vector<8x32xf32>
      %c96_i32_52 = arith.constant 96 : i32
      %132 = tpu.dynamic_rotate %130 by %c96_i32_52 dim 1 : vector<8x128xf32>, i32 -> vector<8x128xf32>
      %133 = vector.extract_strided_slice %132 {offsets = [0, 0], sizes = [8, 32], strides = [1, 1]} : vector<8x128xf32> to vector<8x32xf32>
      %c64_i32_53 = arith.constant 64 : i32
      %134 = tpu.dynamic_rotate %130 by %c64_i32_53 dim 1 : vector<8x128xf32>, i32 -> vector<8x128xf32>
      %135 = vector.extract_strided_slice %134 {offsets = [0, 0], sizes = [8, 32], strides = [1, 1]} : vector<8x128xf32> to vector<8x32xf32>
      %c32_i32_54 = arith.constant 32 : i32
      %136 = tpu.dynamic_rotate %130 by %c32_i32_54 dim 1 : vector<8x128xf32>, i32 -> vector<8x128xf32>
      %137 = vector.extract_strided_slice %136 {offsets = [0, 0], sizes = [8, 32], strides = [1, 1]} : vector<8x128xf32> to vector<8x32xf32>
      %138 = arith.mulf %133, %88 : vector<8x32xf32>
      %139 = arith.mulf %131, %135 : vector<8x32xf32>
      %140 = arith.addf %138, %139 : vector<8x32xf32>
      %141 = math.tanh %140 : vector<8x32xf32>
      %142 = arith.mulf %137, %141 : vector<8x32xf32>
      %143 = arith.index_cast %99 : i32 to index
      %c0_55 = arith.constant 0 : index
      %144 = vector.load %arg9[%143, %c0_55] : memref<64x64xf32, #tpu.memory_space<vmem>>, vector<8x32xf32>
      tpu.vector_store %arg9[%143, %c0_55], %129 {strides = array<i32>} : memref<64x64xf32, #tpu.memory_space<vmem>>, vector<8x32xf32>,
      %145 = arith.index_cast %102 : i32 to index
      %c32_56 = arith.constant 32 : index
      %146 = vector.load %arg9[%145, %c32_56] : memref<64x64xf32, #tpu.memory_space<vmem>>, vector<8x32xf32>
      tpu.vector_store %arg9[%145, %c32_56], %142 {strides = array<i32>} : memref<64x64xf32, #tpu.memory_space<vmem>>, vector<8x32xf32>,
      %147 = tpu.concatenate %129, %142 in 1 : vector<8x32xf32>, vector<8x32xf32> -> vector<8x64xf32>
      %c4_i32_57 = arith.constant 4 : i32
      %148 = arith.muli %arg10, %c4_i32_57 : i32
      %c2_i32_58 = arith.constant 2 : i32
      %149 = arith.addi %148, %c2_i32_58 : i32
      %c8_i32_59 = arith.constant 8 : i32
      %150 = arith.muli %149, %c8_i32_59 : i32
      %151 = tpu.assume_multiple %150, 8 : i32
      %c7_i32_60 = arith.constant 7 : i32
      %152 = arith.subi %c7_i32_60, %149 : i32
      %c8_i32_61 = arith.constant 8 : i32
      %153 = arith.muli %152, %c8_i32_61 : i32
      %154 = tpu.assume_multiple %153, 8 : i32
      %cst_62 = arith.constant dense<0.000000e+00> : vector<8x256xf32>
      %155 = tpu.matmul %147, %10, %cst_62 {dimension_numbers = #tpu.dot_dimension_numbers<[1], [0], [0], [1], [0, 0, 1, 1], [], []>} : vector<8x64xf32>, vector<64x256xf32>, vector<8x256xf32> -> vector<8x256xf32>
      %156 = arith.index_cast %151 : i32 to index
      %c0_63 = arith.constant 0 : index
      %157 = vector.load %arg7[%156, %c0_63] : memref<64x128xf32, #tpu.memory_space<vmem>>, vector<8x128xf32>
      %158 = arith.index_cast %154 : i32 to index
      %c0_64 = arith.constant 0 : index
      %159 = vector.load %arg8[%158, %c0_64] : memref<64x128xf32, #tpu.memory_space<vmem>>, vector<8x128xf32>
      %160 = tpu.concatenate %157, %159 in 1 : vector<8x128xf32>, vector<8x128xf32> -> vector<8x256xf32>
      %161 = arith.addf %160, %155 : vector<8x256xf32>
      %162 = math.tanh %161 : vector<8x256xf32>
      %163 = arith.negf %161 : vector<8x256xf32>
      %164 = math.exp %163 : vector<8x256xf32>
      %cst_65 = arith.constant 1.000000e+00 : f32
      %165 = vector.broadcast %cst_65 : f32 to vector<8x256xf32>
      %166 = arith.addf %165, %164 : vector<8x256xf32>
      %167 = arith.divf %165, %166 : vector<8x256xf32>
      %168 = arith.select %32, %162, %167 : vector<8x256xi1>, vector<8x256xf32>
      %169 = vector.extract_strided_slice %168 {offsets = [0, 0], sizes = [8, 128], strides = [1, 1]} : vector<8x256xf32> to vector<8x128xf32>
      %170 = vector.extract_strided_slice %169 {offsets = [0, 0], sizes = [8, 32], strides = [1, 1]} : vector<8x128xf32> to vector<8x32xf32>
      %c96_i32_66 = arith.constant 96 : i32
      %171 = tpu.dynamic_rotate %169 by %c96_i32_66 dim 1 : vector<8x128xf32>, i32 -> vector<8x128xf32>
      %172 = vector.extract_strided_slice %171 {offsets = [0, 0], sizes = [8, 32], strides = [1, 1]} : vector<8x128xf32> to vector<8x32xf32>
      %c64_i32_67 = arith.constant 64 : i32
      %173 = tpu.dynamic_rotate %169 by %c64_i32_67 dim 1 : vector<8x128xf32>, i32 -> vector<8x128xf32>
      %174 = vector.extract_strided_slice %173 {offsets = [0, 0], sizes = [8, 32], strides = [1, 1]} : vector<8x128xf32> to vector<8x32xf32>
      %c32_i32_68 = arith.constant 32 : i32
      %175 = tpu.dynamic_rotate %169 by %c32_i32_68 dim 1 : vector<8x128xf32>, i32 -> vector<8x128xf32>
      %176 = vector.extract_strided_slice %175 {offsets = [0, 0], sizes = [8, 32], strides = [1, 1]} : vector<8x128xf32> to vector<8x32xf32>
      %177 = arith.mulf %172, %127 : vector<8x32xf32>
      %178 = arith.mulf %170, %174 : vector<8x32xf32>
      %179 = arith.addf %177, %178 : vector<8x32xf32>
      %180 = math.tanh %179 : vector<8x32xf32>
      %181 = arith.mulf %176, %180 : vector<8x32xf32>
      %182 = vector.extract_strided_slice %168 {offsets = [0, 128], sizes = [8, 128], strides = [1, 1]} : vector<8x256xf32> to vector<8x128xf32>
      %183 = vector.extract_strided_slice %182 {offsets = [0, 0], sizes = [8, 32], strides = [1, 1]} : vector<8x128xf32> to vector<8x32xf32>
      %c96_i32_69 = arith.constant 96 : i32
      %184 = tpu.dynamic_rotate %182 by %c96_i32_69 dim 1 : vector<8x128xf32>, i32 -> vector<8x128xf32>
      %185 = vector.extract_strided_slice %184 {offsets = [0, 0], sizes = [8, 32], strides = [1, 1]} : vector<8x128xf32> to vector<8x32xf32>
      %c64_i32_70 = arith.constant 64 : i32
      %186 = tpu.dynamic_rotate %182 by %c64_i32_70 dim 1 : vector<8x128xf32>, i32 -> vector<8x128xf32>
      %187 = vector.extract_strided_slice %186 {offsets = [0, 0], sizes = [8, 32], strides = [1, 1]} : vector<8x128xf32> to vector<8x32xf32>
      %c32_i32_71 = arith.constant 32 : i32
      %188 = tpu.dynamic_rotate %182 by %c32_i32_71 dim 1 : vector<8x128xf32>, i32 -> vector<8x128xf32>
      %189 = vector.extract_strided_slice %188 {offsets = [0, 0], sizes = [8, 32], strides = [1, 1]} : vector<8x128xf32> to vector<8x32xf32>
      %190 = arith.mulf %185, %140 : vector<8x32xf32>
      %191 = arith.mulf %183, %187 : vector<8x32xf32>
      %192 = arith.addf %190, %191 : vector<8x32xf32>
      %193 = math.tanh %192 : vector<8x32xf32>
      %194 = arith.mulf %189, %193 : vector<8x32xf32>
      %195 = arith.index_cast %151 : i32 to index
      %c0_72 = arith.constant 0 : index
      %196 = vector.load %arg9[%195, %c0_72] : memref<64x64xf32, #tpu.memory_space<vmem>>, vector<8x32xf32>
      tpu.vector_store %arg9[%195, %c0_72], %181 {strides = array<i32>} : memref<64x64xf32, #tpu.memory_space<vmem>>, vector<8x32xf32>,
      %197 = arith.index_cast %154 : i32 to index
      %c32_73 = arith.constant 32 : index
      %198 = vector.load %arg9[%197, %c32_73] : memref<64x64xf32, #tpu.memory_space<vmem>>, vector<8x32xf32>
      tpu.vector_store %arg9[%197, %c32_73], %194 {strides = array<i32>} : memref<64x64xf32, #tpu.memory_space<vmem>>, vector<8x32xf32>,
      %199 = tpu.concatenate %181, %194 in 1 : vector<8x32xf32>, vector<8x32xf32> -> vector<8x64xf32>
      %c4_i32_74 = arith.constant 4 : i32
      %200 = arith.muli %arg10, %c4_i32_74 : i32
      %c3_i32 = arith.constant 3 : i32
      %201 = arith.addi %200, %c3_i32 : i32
      %c8_i32_75 = arith.constant 8 : i32
      %202 = arith.muli %201, %c8_i32_75 : i32
      %203 = tpu.assume_multiple %202, 8 : i32
      %c7_i32_76 = arith.constant 7 : i32
      %204 = arith.subi %c7_i32_76, %201 : i32
      %c8_i32_77 = arith.constant 8 : i32
      %205 = arith.muli %204, %c8_i32_77 : i32
      %206 = tpu.assume_multiple %205, 8 : i32
      %cst_78 = arith.constant dense<0.000000e+00> : vector<8x256xf32>
      %207 = tpu.matmul %199, %10, %cst_78 {dimension_numbers = #tpu.dot_dimension_numbers<[1], [0], [0], [1], [0, 0, 1, 1], [], []>} : vector<8x64xf32>, vector<64x256xf32>, vector<8x256xf32> -> vector<8x256xf32>
      %208 = arith.index_cast %203 : i32 to index
      %c0_79 = arith.constant 0 : index
      %209 = vector.load %arg7[%208, %c0_79] : memref<64x128xf32, #tpu.memory_space<vmem>>, vector<8x128xf32>
      %210 = arith.index_cast %206 : i32 to index
      %c0_80 = arith.constant 0 : index
      %211 = vector.load %arg8[%210, %c0_80] : memref<64x128xf32, #tpu.memory_space<vmem>>, vector<8x128xf32>
      %212 = tpu.concatenate %209, %211 in 1 : vector<8x128xf32>, vector<8x128xf32> -> vector<8x256xf32>
      %213 = arith.addf %212, %207 : vector<8x256xf32>
      %214 = math.tanh %213 : vector<8x256xf32>
      %215 = arith.negf %213 : vector<8x256xf32>
      %216 = math.exp %215 : vector<8x256xf32>
      %cst_81 = arith.constant 1.000000e+00 : f32
      %217 = vector.broadcast %cst_81 : f32 to vector<8x256xf32>
      %218 = arith.addf %217, %216 : vector<8x256xf32>
      %219 = arith.divf %217, %218 : vector<8x256xf32>
      %220 = arith.select %32, %214, %219 : vector<8x256xi1>, vector<8x256xf32>
      %221 = vector.extract_strided_slice %220 {offsets = [0, 0], sizes = [8, 128], strides = [1, 1]} : vector<8x256xf32> to vector<8x128xf32>
      %222 = vector.extract_strided_slice %221 {offsets = [0, 0], sizes = [8, 32], strides = [1, 1]} : vector<8x128xf32> to vector<8x32xf32>
      %c96_i32_82 = arith.constant 96 : i32
      %223 = tpu.dynamic_rotate %221 by %c96_i32_82 dim 1 : vector<8x128xf32>, i32 -> vector<8x128xf32>
      %224 = vector.extract_strided_slice %223 {offsets = [0, 0], sizes = [8, 32], strides = [1, 1]} : vector<8x128xf32> to vector<8x32xf32>
      %c64_i32_83 = arith.constant 64 : i32
      %225 = tpu.dynamic_rotate %221 by %c64_i32_83 dim 1 : vector<8x128xf32>, i32 -> vector<8x128xf32>
      %226 = vector.extract_strided_slice %225 {offsets = [0, 0], sizes = [8, 32], strides = [1, 1]} : vector<8x128xf32> to vector<8x32xf32>
      %c32_i32_84 = arith.constant 32 : i32
      %227 = tpu.dynamic_rotate %221 by %c32_i32_84 dim 1 : vector<8x128xf32>, i32 -> vector<8x128xf32>
      %228 = vector.extract_strided_slice %227 {offsets = [0, 0], sizes = [8, 32], strides = [1, 1]} : vector<8x128xf32> to vector<8x32xf32>
      %229 = arith.mulf %224, %179 : vector<8x32xf32>
      %230 = arith.mulf %222, %226 : vector<8x32xf32>
      %231 = arith.addf %229, %230 : vector<8x32xf32>
      %232 = math.tanh %231 : vector<8x32xf32>
      %233 = arith.mulf %228, %232 : vector<8x32xf32>
      %234 = vector.extract_strided_slice %220 {offsets = [0, 128], sizes = [8, 128], strides = [1, 1]} : vector<8x256xf32> to vector<8x128xf32>
      %235 = vector.extract_strided_slice %234 {offsets = [0, 0], sizes = [8, 32], strides = [1, 1]} : vector<8x128xf32> to vector<8x32xf32>
      %c96_i32_85 = arith.constant 96 : i32
      %236 = tpu.dynamic_rotate %234 by %c96_i32_85 dim 1 : vector<8x128xf32>, i32 -> vector<8x128xf32>
      %237 = vector.extract_strided_slice %236 {offsets = [0, 0], sizes = [8, 32], strides = [1, 1]} : vector<8x128xf32> to vector<8x32xf32>
      %c64_i32_86 = arith.constant 64 : i32
      %238 = tpu.dynamic_rotate %234 by %c64_i32_86 dim 1 : vector<8x128xf32>, i32 -> vector<8x128xf32>
      %239 = vector.extract_strided_slice %238 {offsets = [0, 0], sizes = [8, 32], strides = [1, 1]} : vector<8x128xf32> to vector<8x32xf32>
      %c32_i32_87 = arith.constant 32 : i32
      %240 = tpu.dynamic_rotate %234 by %c32_i32_87 dim 1 : vector<8x128xf32>, i32 -> vector<8x128xf32>
      %241 = vector.extract_strided_slice %240 {offsets = [0, 0], sizes = [8, 32], strides = [1, 1]} : vector<8x128xf32> to vector<8x32xf32>
      %242 = arith.mulf %237, %192 : vector<8x32xf32>
      %243 = arith.mulf %235, %239 : vector<8x32xf32>
      %244 = arith.addf %242, %243 : vector<8x32xf32>
      %245 = math.tanh %244 : vector<8x32xf32>
      %246 = arith.mulf %241, %245 : vector<8x32xf32>
      %247 = arith.index_cast %203 : i32 to index
      %c0_88 = arith.constant 0 : index
      %248 = vector.load %arg9[%247, %c0_88] : memref<64x64xf32, #tpu.memory_space<vmem>>, vector<8x32xf32>
      tpu.vector_store %arg9[%247, %c0_88], %233 {strides = array<i32>} : memref<64x64xf32, #tpu.memory_space<vmem>>, vector<8x32xf32>,
      %249 = arith.index_cast %206 : i32 to index
      %c32_89 = arith.constant 32 : index
      %250 = vector.load %arg9[%249, %c32_89] : memref<64x64xf32, #tpu.memory_space<vmem>>, vector<8x32xf32>
      tpu.vector_store %arg9[%249, %c32_89], %246 {strides = array<i32>} : memref<64x64xf32, #tpu.memory_space<vmem>>, vector<8x32xf32>,
      %251 = tpu.concatenate %233, %246 in 1 : vector<8x32xf32>, vector<8x32xf32> -> vector<8x64xf32>
      scf.yield %251, %231, %244 : vector<8x64xf32>, vector<8x32xf32>, vector<8x32xf32>
    }
    %c2_i32_18 = arith.constant 2 : i32
    %c0_19 = arith.constant 0 : index
    %c0_20 = arith.constant 0 : index
    %37 = vector.load %arg9[%c0_19, %c0_20] : memref<64x64xf32, #tpu.memory_space<vmem>>, vector<64x64xf32>
    %c0_21 = arith.constant 0 : index
    %c0_22 = arith.constant 0 : index
    %38 = vector.load %arg4[%c0_21, %c0_22] : memref<64x128xf32, #tpu.memory_space<vmem>>, vector<64x128xf32>
    %cst_23 = arith.constant dense<0.000000e+00> : vector<64x128xf32>
    %39 = tpu.matmul %37, %38, %cst_23 {dimension_numbers = #tpu.dot_dimension_numbers<[1], [0], [0], [1], [0, 0, 1, 1], [], []>} : vector<64x64xf32>, vector<64x128xf32>, vector<64x128xf32> -> vector<64x128xf32>
    %c0_24 = arith.constant 0 : index
    %c0_25 = arith.constant 0 : index
    %40 = vector.load %arg5[%c0_24, %c0_25] : memref<1x128xf32, #tpu.memory_space<vmem>>, vector<1x128xf32>
    %41 = vector.broadcast %40 : vector<1x128xf32> to vector<64x128xf32>
    %42 = arith.addf %39, %41 : vector<64x128xf32>
    %c0_26 = arith.constant 0 : index
    %c0_27 = arith.constant 0 : index
    %43 = vector.load %arg6[%c0_26, %c0_27] : memref<64x128xf32, #tpu.memory_space<vmem>>, vector<64x128xf32>
    tpu.vector_store %arg6[%c0_26, %c0_27], %42 {strides = array<i32>} : memref<64x128xf32, #tpu.memory_space<vmem>>, vector<64x128xf32>,
    return
  }
}

</mosaic_0001>

<bundles_post_ra>
// kernel: tpu_custom_call.1
= control target key start
LH: loop header
LB: loop body
LE: loop exit
PB: predicated region body
PF: predicated region fallthrough
CT: control target
= control target key end

     0   :  { %11 = vsyncpa [#allocation6], 0  ;;  %s1853_s0 = inlined_call_operand.vmem [shape: f32[64,16], index: 0, kind: input, shape index: {}]   ;;  %s1854_s1 = inlined_call_operand.hbm [shape: f32[16,256], index: 1, kind: input, shape index: {}]   ;;  %s1855_s2 = inlined_call_operand.vmem [shape: f32[1,256], index: 2, kind: input, shape index: {}]   ;;  %s1856_s3 = inlined_call_operand.hbm [shape: f32[64,256], index: 3, kind: input, shape index: {}]   ;;  %s1857_s4 = inlined_call_operand.vmem [shape: f32[64,128], index: 4, kind: input, shape index: {}]   ;;  %s1858_s5 = inlined_call_operand.vmem [shape: f32[1,128], index: 5, kind: input, shape index: {}]   ;;  %s1859_s6 = inlined_call_operand.hbm [shape: f32[64,128], index: 6, kind: output, shape index: {}]  }
   0x1   :  { %12 = vsyncpa [#allocation9], 0 }
   0x2   :  { %13 = vsyncpa [#allocation7], 0  ;;  %s1461_s21 = smov [#allocation5]   ;;  %s1357_s25 = scalar_lea.hbm %s1854_s1, 512 }
   0x3   :  { %s21_s22 = sshll.u32 %s1461_s21, 4  ;;  %p1358_p0 = scmp.ne.s32.totalorder %s1854_s1, %s1357_s25  ;;  %s22_s22 = int_to_ptr.vmem [resolvable:$true] %s21_s22 }
   0x4   :  { %p1361_p1 = scmp.lt.u32.totalorder %s1357_s25, %s1854_s1 }
   0x6   :  { %p1363_p2 = pnand %p1361_p1, %p1358_p0 }
   0x8   :  { %1366 = shalt.err (!%p1363_p2)
}
   0x9   :  { %s1367_s30 = scalar_lea.vmem %s22_s22, 512  ;;  %p1372_p4 = scmp.lt.s32.totalorder %s22_s22, %s22_s22 }
   0xa   :  { %p1368_p3 = scmp.ne.s32.totalorder %s22_s22, %s1367_s30  ;;  %p1373_p5 = scmp.lt.s32.totalorder %s1367_s30, %s1367_s30 }
   0xc   :  { %p1374_p6 = por %p1373_p5, %p1372_p4 }
   0xe   :  { %p1375_p7 = pnand %p1374_p6, %p1368_p3 }
  0x10   :  { %1378 = shalt.err (!%p1375_p7)
}
  0x11   :  { %s1462_s7 = smov 256   ;;  %s1463_s8 = smov 16  }
  0x12   :  { %27 = dma.hbm_to_vmem [thread:$0]  %s1854_s1, 512, %s22_s22, [#allocation6], %s1462_s7, %s1462_s7, %s1463_s8  }
  0x13   :  { %s1464_s11 = smov [#allocation8]   ;;  %s1379_s15 = scalar_lea.hbm %s1856_s3, 2048 }
  0x14   :  { %s35_s12 = sshll.u32 %s1464_s11, 4  ;;  %p1380_p8 = scmp.ne.s32.totalorder %s1856_s3, %s1379_s15  ;;  %s36_s12 = int_to_ptr.vmem [resolvable:$true] %s35_s12 }
  0x15   :  { %p1383_p9 = scmp.lt.u32.totalorder %s1379_s15, %s1856_s3 }
  0x17   :  { %p1385_p10 = pnand %p1383_p9, %p1380_p8 }
  0x19   :  { %1388 = shalt.err (!%p1385_p10)
}
  0x1a   :  { %s1389_s20 = scalar_lea.vmem %s36_s12, 2048  ;;  %p1394_p12 = scmp.lt.s32.totalorder %s36_s12, %s36_s12 }
  0x1b   :  { %p1390_p11 = scmp.ne.s32.totalorder %s36_s12, %s1389_s20  ;;  %p1395_p13 = scmp.lt.s32.totalorder %s1389_s20, %s1389_s20 }
  0x1d   :  { %p1396_p0 = por %p1395_p13, %p1394_p12 }
  0x1f   :  { %p1397_p1 = pnand %p1396_p0, %p1390_p11 }
  0x21   :  { %1400 = shalt.err (!%p1397_p1)
}
  0x22   :  { %41 = dma.hbm_to_vmem [thread:$0]  %s1856_s3, 2048, %s36_s12, [#allocation9], %s1462_s7, %s1462_s7, %s1463_s8  }
  0x23   :  { %1439 = dma.done.wait [#allocation6], 512  }
  0x24   :  { %1440 = vsyncadd [#allocation6], 4294966784 }
  0x25   :  { %1441 = dma.done.wait [#allocation9], 2048  }
  0x26   :  { %1442 = vsyncadd [#allocation9], 4294965248  ;;  %v1465_v0 = vmov 0.0   ;;  %v1532_v1 = vld [vmem:[#allocation8] sm:$0xff]  ;;  %v1534_v2 = vld [vmem:[#allocation8 + $0x8] sm:$0xff]  ;;  %vm76_vm0 = vcmask 130048   ;;  %v66_v31 = vlaneseq }
  0x27   :  { %165 = vmatprep.mubr.f32.mxu0 %v1465_v0  ;;  %189 = vmatprep.mubr.f32.mxu1 %v1465_v0  ;;  %v1536_v3 = vld [vmem:[#allocation8 + $0x10] sm:$0xff]  ;;  %v1538_v4 = vld [vmem:[#allocation8 + $0x18] sm:$0xff]  ;;  %v1540_v5 = vld [vmem:[#allocation8 + $0x20] sm:$0xff] }
  0x28   :  { %v1542_v6 = vld [vmem:[#allocation8 + $0x28] sm:$0xff]  ;;  %v1544_v7 = vld [vmem:[#allocation8 + $0x30] sm:$0xff]  ;;  %v1546_v8 = vld [vmem:[#allocation8 + $0x38] sm:$0xff]  ;;  %v247_v32 = vand.u32 127, %v66_v31  ;;  %v67_v37 = vshrl.u32 %v66_v31, 7 }
  0x29   :  { %v1548_v9 = vld [vmem:[#allocation8 + $0x40] sm:$0xff]  ;;  %v1550_v10 = vld [vmem:[#allocation8 + $0x48] sm:$0xff]  ;;  %v1552_v11 = vld [vmem:[#allocation8 + $0x50] sm:$0xff] }
  0x2a   :  { %v1554_v12 = vld [vmem:[#allocation8 + $0x58] sm:$0xff]  ;;  %v1556_v13 = vld [vmem:[#allocation8 + $0x60] sm:$0xff]  ;;  %v1558_v14 = vld [vmem:[#allocation8 + $0x68] sm:$0xff]  ;;  %v248_v33 = vadd.s32 128, %v247_v32  ;;  %vm273_vm1 = vcmp.ge.s32.totalorder %v247_v32, 64  ;;  %vm275_vm2 = vcmp.lt.s32.totalorder %v247_v32, 96 }
  0x2b   :  { %v1560_v15 = vld [vmem:[#allocation8 + $0x70] sm:$0xff]  ;;  %v1562_v16 = vld [vmem:[#allocation8 + $0x78] sm:$0xff]  ;;  %v61_v17 = vld [vmem:[#allocation5 + $0x8] sm:$0xff]  ;;  %v68_v38 = vsub.s32 0, %v67_v37  ;;  %v72_v40 = vsub.s32 1, %v67_v37 }
  0x2c   :  { %v63_v18 = vld [vmem:[#allocation5 + $0x18] sm:$0xff]  ;;  %v60_v20 = vld [vmem:[#allocation5] sm:$0xff]  ;;  %v62_v21 = vld [vmem:[#allocation5 + $0x10] sm:$0xff]  ;;  %v260_v35 = vand.u32 127, %v248_v33 }
  0x2d   :  { %v1155_v19 = vpack.c.bf16 %v63_v18, %v61_v17  ;;  %v1157_v22 = vpack.c.bf16 %v62_v21, %v60_v20  ;;  %v52_v23 = vld [vmem:[%s1853_s0] sm:$0xff]  ;;  %v53_v25 = vld [vmem:[%s1853_s0 + $0x8] sm:$0xff]  ;;  %v54_v27 = vld [vmem:[%s1853_s0 + $0x10] sm:$0xff] }
  0x2e   :  { %v56_v24 = vld [vmem:[%s1853_s0 + $0x20] sm:$0xff]  ;;  %v57_v26 = vld [vmem:[%s1853_s0 + $0x28] sm:$0xff]  ;;  %v58_v28 = vld [vmem:[%s1853_s0 + $0x30] sm:$0xff]  ;;  %vm274_vm4 = vcmp.ge.s32.totalorder %v260_v35, 64  ;;  %vm276_vm5 = vcmp.lt.s32.totalorder %v260_v35, 96 }
  0x2f   :  { %1156 = vmatprep.subr.bf16.mxu0 %v1155_v19  ;;  %1239 = vmatprep.subr.bf16.mxu1 %v1155_v19  ;;  %v55_v29 = vld [vmem:[%s1853_s0 + $0x18] sm:$0xff]  ;;  %vm1596_vm3 = vmand %vm273_vm1, %vm275_vm2  ;;  %v64_v39 = vld [vmem:[%s1855_s2] sm:$0x3]  ;;  %s1613_s2 = smov 0  }
  0x30   :  { %1158 = vmatpush1.bf16.msra.mxu0 %v1157_v22  ;;  %1240 = vmatpush1.bf16.msra.mxu1 %v1157_v22  ;;  %v59_v30 = vld [vmem:[%s1853_s0 + $0x38] sm:$0xff]  ;;  %vm1600_vm6 = vmand %vm274_vm4, %vm276_vm5  ;;  %v69_v41 = vrot.slane %v64_v39, %v68_v38  ;;  %v73_v42 = vrot.slane %v64_v39, %v72_v40 }
  0x33   :  { %1052 = vmatmul.mubr.msk.f32.vlgmr.msra.gmra.mrb[0].mxu0 %vm76_vm0, %v52_v23  ;;  %1056 = vmatmul.mubr.msk.f32.vlgmr.msra.gmra.mrb[0].mxu1 %vm76_vm0, %v56_v24 }
  0x34   :  { %171 = vmatprep.mubr.f32.mxu0 %v1465_v0  ;;  %195 = vmatprep.mubr.f32.mxu1 %v1465_v0 }
  0x37   :  { %1053 = vmatmul.mubr.msk.f32.gmra.mrb[2].mxu0 %vm76_vm0, %v53_v25  ;;  %1057 = vmatmul.mubr.msk.f32.gmra.mrb[2].mxu1 %vm76_vm0, %v57_v26 }
  0x38   :  { %177 = vmatprep.mubr.f32.mxu0 %v1465_v0  ;;  %201 = vmatprep.mubr.f32.mxu1 %v1465_v0 }
  0x3b   :  { %1054 = vmatmul.mubr.msk.f32.gmra.mrb[4].mxu0 %vm76_vm0, %v54_v27  ;;  %1058 = vmatmul.mubr.msk.f32.gmra.mrb[4].mxu1 %vm76_vm0, %v58_v28  ;;  %v1607_v27 = vmov 0.0   ;;  %v1609_v28 = vmov 0.0  }
  0x3c   :  { %183 = vmatprep.mubr.f32.mxu0 %v1465_v0  ;;  %207 = vmatprep.mubr.f32.mxu1 %v1465_v0 }
  0x3f   :  { %1055 = vmatmul.mubr.msk.f32.gmra.mrb[6].mxu0 %vm76_vm0, %v55_v29  ;;  %1059 = vmatmul.mubr.msk.f32.gmra.mrb[6].mxu1 %vm76_vm0, %v59_v30  ;;  %v1611_v29 = vmov 0.0  }
 0x106   :  { %v167_v43 = vpop.f32.mrb[0].mxu0  ;;  %v191_v44 = vpop.f32.mrb[0].mxu1 }
 0x107   :  { %v168_v45 = vadd.f32 %v167_v43, %v69_v41  ;;  %v192_v46 = vadd.f32 %v191_v44, %v69_v41  ;;  %v169_v47 = vpop.f32.mrb[1].mxu0  ;;  %v193_v48 = vpop.f32.mrb[1].mxu1 }
 0x108   :  { %v170_v49 = vadd.f32 %v169_v47, %v73_v42  ;;  %v194_v50 = vadd.f32 %v193_v48, %v73_v42 }
 0x109   :  { %214 = vst [vmem:[#allocation2] sm:$0xff] %v168_v45  ;;  %218 = vst [vmem:[#allocation2 + $0x20] sm:$0xff] %v192_v46 }
 0x10a   :  { %222 = vst [vmem:[#allocation3] sm:$0xff] %v170_v49  ;;  %226 = vst [vmem:[#allocation3 + $0x20] sm:$0xff] %v194_v50  ;;  %v173_v51 = vpop.f32.mrb[2].mxu0  ;;  %v197_v52 = vpop.f32.mrb[2].mxu1 }
 0x10b   :  { %v174_v53 = vadd.f32 %v173_v51, %v69_v41  ;;  %v198_v54 = vadd.f32 %v197_v52, %v69_v41  ;;  %v175_v55 = vpop.f32.mrb[3].mxu0  ;;  %v199_v56 = vpop.f32.mrb[3].mxu1 }
 0x10c   :  { %v176_v57 = vadd.f32 %v175_v55, %v73_v42  ;;  %v200_v58 = vadd.f32 %v199_v56, %v73_v42 }
 0x10d   :  { %215 = vst [vmem:[#allocation2 + $0x8] sm:$0xff] %v174_v53  ;;  %219 = vst [vmem:[#allocation2 + $0x28] sm:$0xff] %v198_v54 }
 0x10e   :  { %223 = vst [vmem:[#allocation3 + $0x8] sm:$0xff] %v176_v57  ;;  %227 = vst [vmem:[#allocation3 + $0x28] sm:$0xff] %v200_v58  ;;  %v179_v59 = vpop.f32.mrb[4].mxu0  ;;  %v203_v60 = vpop.f32.mrb[4].mxu1 }
 0x10f   :  { %v180_v61 = vadd.f32 %v179_v59, %v69_v41  ;;  %v204_v62 = vadd.f32 %v203_v60, %v69_v41  ;;  %v181_v63 = vpop.f32.mrb[5].mxu0  ;;  %v205_v0 = vpop.f32.mrb[5].mxu1 }
 0x110   :  { %v182_v17 = vadd.f32 %v181_v63, %v73_v42  ;;  %v206_v18 = vadd.f32 %v205_v0, %v73_v42 }
 0x111   :  { %216 = vst [vmem:[#allocation2 + $0x10] sm:$0xff] %v180_v61  ;;  %220 = vst [vmem:[#allocation2 + $0x30] sm:$0xff] %v204_v62 }
 0x112   :  { %224 = vst [vmem:[#allocation3 + $0x10] sm:$0xff] %v182_v17  ;;  %228 = vst [vmem:[#allocation3 + $0x30] sm:$0xff] %v206_v18  ;;  %v185_v19 = vpop.f32.mrb[6].mxu0  ;;  %v209_v20 = vpop.f32.mrb[6].mxu1 }
 0x113   :  { %v186_v21 = vadd.f32 %v185_v19, %v69_v41  ;;  %v210_v22 = vadd.f32 %v209_v20, %v69_v41  ;;  %v187_v23 = vpop.f32.mrb[7].mxu0  ;;  %v211_v24 = vpop.f32.mrb[7].mxu1 }
 0x114   :  { %v188_v25 = vadd.f32 %v187_v23, %v73_v42  ;;  %v212_v26 = vadd.f32 %v211_v24, %v73_v42 }
 0x115   :  { %217 = vst [vmem:[#allocation2 + $0x18] sm:$0xff] %v186_v21  ;;  %221 = vst [vmem:[#allocation2 + $0x38] sm:$0xff] %v210_v22 }
 0x116   :  { %225 = vst [vmem:[#allocation3 + $0x18] sm:$0xff] %v188_v25  ;;  %229 = vst [vmem:[#allocation3 + $0x38] sm:$0xff] %v212_v26 }
 0x117 LB: > { %v1159_v30 = vpack.c.bf16 %v1538_v4, %v1534_v2  ;;  %v1629_v31 = vpack.c.bf16 %v1536_v3, %v1532_v1  ;;  %v1633_v32 = vpack.c.bf16 %v1546_v8, %v1542_v6  ;;  %v1638_v33 = vpack.c.bf16 %v1544_v7, %v1540_v5  ;;  %s1681_s14 = sshll.u32 %s1459_s2, 2  ;;  %s1061_s16 = sshll.u32 %s1459_s2, 5  ;;  %s1459_s2 = sphi %s1613_s2, %s284_s2   ;;  %v1455_v29 = vphi %v1611_v29, %v814_v29   ;;  %v1451_v28 = vphi %v1609_v28, %v792_v28   ;;  %v1447_v27 = vphi %v1607_v27, %v803_v27  }
 0x118   : > { %v1466_v35 = vmov 0.0   ;;  %v1644_v37 = vpack.c.bf16 %v1554_v12, %v1550_v10  ;;  %v1652_v38 = vpack.c.bf16 %v1552_v11, %v1548_v9  ;;  %v1657_v39 = vpack.c.bf16 %v1562_v16, %v1558_v14  ;;  %s290_s15 = ssub.s32 7, %s1681_s14  ;;  %s1689_s18 = scalar_lea.vmem [#allocation2], %s1061_s16 }
 0x119   : > { %1160 = vmatprep.subr.bf16.mxu0 %v1159_v30  ;;  %1176 = vmatprep.subr.bf16.mxu1 %v1159_v30  ;;  %v1664_v40 = vpack.c.bf16 %v1560_v15, %v1556_v13  ;;  %vm292_vm7 = vcmask 523264   ;;  %s1685_s17 = sshll.u32 %s290_s15, 3  ;;  %s1467_s20 = smov 32   ;;  %vm412_vm8 = vcmask 261120   ;;  %vm419_vm9 = vcmask 523520  }
 0x11a   : > { %1162 = vmatpush1.bf16.msra.mxu0 %v1629_v31  ;;  %360 = vmatprep.mubr.f32.mxu0 %v1466_v35  ;;  %s369_s19 = scalar_lea.vmem [#allocation3], %s1685_s17  ;;  %s1468_s1 = smov 96  }
 0x11b   : > { %1164 = vmatprep.subr.bf16.mxu0 %v1633_v32  ;;  %1178 = vmatpush1.bf16.msra.mxu1 %v1629_v31  ;;  %s1469_s21 = smov 64   ;;  %s1714_s3 = scalar_lea.vmem [#allocation4], %s1061_s16 }
 0x11c   : > { %1180 = vmatprep.subr.bf16.mxu1 %v1633_v32  ;;  %493 = vmatprep.mubr.f32.mxu1 %v1466_v35  ;;  %v368_v41 = vld [vmem:[%s1689_s18] sm:$0xff]  ;;  %s418_s22 = scalar_lea.vmem [#allocation4], %s1685_s17  ;;  %s424_s23 = ssub.s32 6, %s1681_s14 }
 0x11d   : > { %v370_v42 = vld [vmem:[%s369_s19] sm:$0xff]  ;;  %s1731_s24 = sshll.u32 %s424_s23, 3  ;;  %s555_s27 = ssub.s32 5, %s1681_s14 }
 0x11e   : > { %1166 = vmatpush1.bf16.msra.mxu0 %v1638_v33  ;;  %s502_s25 = scalar_lea.vmem [#allocation3], %s1731_s24  ;;  %s550_s26 = scalar_lea.vmem [#allocation4], %s1731_s24 }
 0x11f   : > { %1168 = vmatprep.subr.bf16.mxu0 %v1644_v37  ;;  %1182 = vmatpush1.bf16.msra.mxu1 %v1638_v33  ;;  %s1755_s28 = sshll.u32 %s555_s27, 3  ;;  %s686_s7 = ssub.s32 4, %s1681_s14 }
 0x120   : > { %1184 = vmatprep.subr.bf16.mxu1 %v1644_v37  ;;  %s633_s29 = scalar_lea.vmem [#allocation3], %s1755_s28  ;;  %s681_s30 = scalar_lea.vmem [#allocation4], %s1755_s28 }
 0x121   : > { %s1777_s8 = sshll.u32 %s686_s7, 3  ;;  %s284_s2 = sadd.s32 1, %s1459_s2  }
 0x122   : > { %1170 = vmatpush1.bf16.msra.mxu0 %v1652_v38  ;;  %s764_s9 = scalar_lea.vmem [#allocation3], %s1777_s8  ;;  %s812_s10 = scalar_lea.vmem [#allocation4], %s1777_s8 }
 0x123   : > { %1172 = vmatprep.subr.bf16.mxu0 %v1657_v39  ;;  %1186 = vmatpush1.bf16.msra.mxu1 %v1652_v38  ;;  %p281_p2 = scmp.ge.s32.totalorder %s284_s2, 2  }
 0x124   : > { %1188 = vmatprep.subr.bf16.mxu1 %v1657_v39  ;;  %v827_v1 = vld [vmem:[%s1857_s4 + $0x20] sm:$0xff] (%p281_p2)  ;;  %v828_v2 = vld [vmem:[%s1857_s4 + $0x28] sm:$0xff] (%p281_p2)  ;;  %v829_v6 = vld [vmem:[%s1857_s4 + $0x30] sm:$0xff] (%p281_p2)  ;;  %s1470_s24 = smov (%p281_p2), [#allocation10]  }
 0x125   :  { %v1231_v5 = vpack.c.bf16 (%p281_p2), %v828_v2, %v827_v1  ;;  %v830_v7 = vld [vmem:[%s1857_s4 + $0x38] sm:$0xff] (%p281_p2)  ;;  %v1096_v15 = vld [vmem:[%s1858_s5] ss:$0 sm:$0xff] (%p281_p2) }
 0x126   : > { %1174 = vmatpush1.bf16.msra.mxu0 %v1664_v40  ;;  %v1235_v8 = vpack.c.bf16 (%p281_p2), %v830_v7, %v829_v6 }
 0x127   : > { %1190 = vmatpush1.bf16.msra.mxu1 %v1664_v40  ;;  %1192 = vmatprep.subr.bf16.mxu0 %v1159_v30 }
 0x128   : > { %1208 = vmatprep.subr.bf16.mxu1 %v1159_v30  ;;  %v503_v30 = vld [vmem:[%s502_s25] sm:$0xff]  ;;  %s981_s25 = sshll.u32 (%p281_p2), %s1470_s24, 4  ;;  %s982_s25 = int_to_ptr.vmem [resolvable:$true] %s981_s25 }
 0x129   : > { %1063 = vmatmul.mubr.msk.f32.vlgmr.msra.gmra.mrb[0].mxu0 %vm292_vm7, %v1455_v29  ;;  %v1070_v29 = vld [vmem:[%s1689_s18 + $0x8] sm:$0xff]  ;;  %s1401_s5 = scalar_lea.vmem (%p281_p2), %s982_s25, 1024  ;;  %p1406_p4 = scmp.lt.s32.totalorder (%p281_p2), %s982_s25, %s982_s25 }
 0x12a   : > { %1194 = vmatpush1.bf16.msra.mxu0 %v1629_v31  ;;  %624 = vmatprep.mubr.f32.mxu0 %v1466_v35  ;;  %p1402_p3 = scmp.ne.s32.totalorder (%p281_p2), %s982_s25, %s1401_s5  ;;  %p1407_p5 = scmp.lt.s32.totalorder (%p281_p2), %s1401_s5, %s1401_s5 }
 0x12b   : > { %1196 = vmatprep.subr.bf16.mxu0 %v1633_v32 }
 0x12c   :  { %p1408_p6 = por (%p281_p2), %p1407_p5, %p1406_p4 }
 0x12e   : > { %1198 = vmatpush1.bf16.msra.mxu0 %v1638_v33  ;;  %p1409_p7 = pnand (%p281_p2), %p1408_p6, %p1402_p3 }
 0x12f   : > { %1200 = vmatprep.subr.bf16.mxu0 %v1644_v37 }
 0x132   : > { %1202 = vmatpush1.bf16.msra.mxu0 %v1652_v38 }
 0x133   : > { %1204 = vmatprep.subr.bf16.mxu0 %v1657_v39 }
 0x136   : > { %1206 = vmatpush1.bf16.msra.mxu0 %v1664_v40 }
 0x1fc   : > { %v362_v43 = vpop.f32.mrb[0].mxu0 }
 0x1fd   : > { %v371_v44 = vadd.f32 %v368_v41, %v362_v43  ;;  %v364_v45 = vpop.f32.mrb[1].mxu0 }
 0x1fe   : > { %v372_v46 = vadd.f32 %v370_v42, %v364_v45 }
 0x1ff   : > { %v1064_v47 = vmul.f32 -1.442695, %v371_v44 }
 0x200   : > { %v1065_v48 = vmul.f32 -1.442695, %v372_v46 }
 0x201   : > { %1293 = vpow2.f32 %v1064_v47 }
 0x202   : > { %1295 = vpow2.f32 %v1065_v48 }
 0x203   : > { %1297 = vtanh.f32 %v372_v46 }
 0x20b   : > { %v1294_v49 = vpop.eup %1293 }
 0x20c   : > { %v1296_v50 = vpop.eup %1295  ;;  %v381_v51 = vadd.f32 1.0, %v1294_v49 }
 0x20d   : > { %v382_v52 = vadd.f32 1.0, %v1296_v50  ;;  %v1298_v53 = vpop.eup %1297 }
 0x20f   : > { %1299 = vrcp.f32 %v382_v52 }
 0x210   : > { %1301 = vrcp.f32 %v381_v51 }
 0x211   : > { %1303 = vtanh.f32 %v371_v44 }
 0x219   : > { %v1300_v54 = vpop.eup %1299 }
 0x21a   : > { %v388_v55 = vsel %vm1600_vm6, %v1298_v53, %v1300_v54  ;;  %v1302_v56 = vpop.eup %1301 }
 0x21b   : > { %404 = vrot.lane.b32.xlu1 %v388_v55, %s1467_s20  ;;  %400 = vrot.lane.b32.xlu0 %v388_v55, %s1468_s1  ;;  %v1304_v57 = vpop.eup %1303 }
 0x21c   : > { %v387_v58 = vsel %vm1596_vm3, %v1304_v57, %v1302_v56 }
 0x21f   : > { %389 = vrot.lane.b32.xlu1 %v387_v58, %s1468_s1  ;;  %402 = vrot.lane.b32.xlu0 %v388_v55, %s1469_s21 }
 0x223   : > { %393 = vrot.lane.b32.xlu1 %v387_v58, %s1467_s20  ;;  %391 = vrot.lane.b32.xlu0 %v387_v58, %s1469_s21 }
 0x28d   : > { %v405_v59 = vpop.permute.xlu1 %404  ;;  %v401_v60 = vpop.permute.xlu0 %400 }
 0x28e   : > { %v406_v62 = vmul.f32 %v1447_v27, %v401_v60 }
 0x291   : > { %v403_v61 = vpop.permute.xlu0 %402  ;;  %v390_v0 = vpop.permute.xlu1 %389 }
 0x292   : > { %v407_v63 = vmul.f32 %v403_v61, %v388_v55  ;;  %v395_v19 = vmul.f32 %v1451_v28, %v390_v0 }
 0x294   : > { %v1704_v17 = vadd.f32 %v407_v63, %v406_v62 }
 0x295   : > { %v392_v18 = vpop.permute.xlu0 %391  ;;  %v394_v25 = vpop.permute.xlu1 %393 }
 0x296   : > { %1305 = vtanh.f32 %v1704_v17  ;;  %v396_v20 = vmul.f32 %v392_v18, %v387_v58 }
 0x298   : > { %v1708_v21 = vadd.f32 %v396_v20, %v395_v19  ;;  %v1080_v19 = vld [vmem:[%s1689_s18 + $0x10] sm:$0xff]  ;;  %v634_v20 = vld [vmem:[%s633_s29] sm:$0xff] }
 0x29a   : > { %1307 = vtanh.f32 %v1708_v21 }
 0x2a0   : > { %v1306_v22 = vpop.eup %1305 }
 0x2a1   : > { %v410_v23 = vmul.f32 %v1306_v22, %v405_v59 }
 0x2a3   : > { %415 = vrot.lane.b32.xlu0 %v410_v23, %s1467_s20 }
 0x2a4   : > { %v1308_v24 = vpop.eup %1307 }
 0x2a5   : > { %v399_v26 = vmul.f32 %v1308_v24, %v394_v25 }
 0x2a7   : > { %413 = vst.msk [vmem:[%s1714_s3] sm:$0xff] %vm412_vm8, %v399_v26 }
 0x315   : > { %v416_v27 = vpop.permute.xlu0 %415 }
 0x316   : > { %420 = vst.msk [vmem:[%s418_s22] sm:$0xff] %vm419_vm9, %v416_v27  ;;  %v421_v28 = vsel %vm412_vm8, %v399_v26, %v416_v27 }
 0x317   : > { %1067 = vmatmul.mubr.msk.f32.vlgmr.msra.gmra.mrb[0].mxu1 %vm292_vm7, %v421_v28 }
 0x318   : > { %1210 = vmatpush1.bf16.msra.mxu1 %v1629_v31  ;;  %755 = vmatprep.mubr.f32.mxu1 %v1466_v35 }
 0x319   : > { %1212 = vmatprep.subr.bf16.mxu1 %v1633_v32 }
 0x31c   : > { %1214 = vmatpush1.bf16.msra.mxu1 %v1638_v33 }
 0x31d   : > { %1216 = vmatprep.subr.bf16.mxu1 %v1644_v37 }
 0x320   : > { %1218 = vmatpush1.bf16.msra.mxu1 %v1652_v38 }
 0x321   : > { %1220 = vmatprep.subr.bf16.mxu1 %v1657_v39 }
 0x324   : > { %1222 = vmatpush1.bf16.msra.mxu1 %v1664_v40 }
 0x3ea   : > { %v495_v31 = vpop.f32.mrb[0].mxu1 }
 0x3eb   : > { %v504_v35 = vadd.f32 %v1070_v29, %v495_v31  ;;  %v497_v32 = vpop.f32.mrb[1].mxu1 }
 0x3ec   : > { %v505_v41 = vadd.f32 %v503_v30, %v497_v32 }
 0x3ed   : > { %v1071_v33 = vmul.f32 -1.442695, %v504_v35 }
 0x3ee   : > { %v1072_v42 = vmul.f32 -1.442695, %v505_v41 }
 0x3ef   : > { %1309 = vpow2.f32 %v1071_v33 }
 0x3f0   : > { %1311 = vpow2.f32 %v1072_v42 }
 0x3f1   : > { %1313 = vtanh.f32 %v505_v41 }
 0x3f9   : > { %v1310_v37 = vpop.eup %1309 }
 0x3fa   : > { %v1312_v38 = vpop.eup %1311  ;;  %v514_v39 = vadd.f32 1.0, %v1310_v37 }
 0x3fb   : > { %v515_v43 = vadd.f32 1.0, %v1312_v38  ;;  %v1314_v40 = vpop.eup %1313 }
 0x3fd   : > { %1315 = vrcp.f32 %v515_v43 }
 0x3fe   : > { %1317 = vrcp.f32 %v514_v39 }
 0x3ff   : > { %1319 = vtanh.f32 %v504_v35 }
 0x407   : > { %v1316_v44 = vpop.eup %1315 }
 0x408   : > { %v521_v45 = vsel %vm1600_vm6, %v1314_v40, %v1316_v44  ;;  %v1318_v46 = vpop.eup %1317 }
 0x409   : > { %535 = vrot.lane.b32.xlu0 %v521_v45, %s1469_s21  ;;  %533 = vrot.lane.b32.xlu1 %v521_v45, %s1468_s1  ;;  %v1320_v47 = vpop.eup %1319 }
 0x40a   : > { %v520_v48 = vsel %vm1596_vm3, %v1320_v47, %v1318_v46 }
 0x40d   : > { %522 = vrot.lane.b32.xlu0 %v520_v48, %s1468_s1  ;;  %537 = vrot.lane.b32.xlu1 %v521_v45, %s1467_s20 }
 0x411   : > { %526 = vrot.lane.b32.xlu0 %v520_v48, %s1467_s20  ;;  %524 = vrot.lane.b32.xlu1 %v520_v48, %s1469_s21 }
 0x47b   : > { %v536_v49 = vpop.permute.xlu0 %535  ;;  %v534_v50 = vpop.permute.xlu1 %533 }
 0x47c   : > { %v540_v51 = vmul.f32 %v536_v49, %v521_v45  ;;  %v539_v52 = vmul.f32 %v534_v50, %v1704_v17 }
 0x47e   : > { %v541_v53 = vadd.f32 %v540_v51, %v539_v52 }
 0x47f   : > { %v538_v54 = vpop.permute.xlu1 %537  ;;  %v523_v55 = vpop.permute.xlu0 %522 }
 0x480   : > { %1321 = vtanh.f32 %v541_v53  ;;  %v528_v57 = vmul.f32 %v523_v55, %v1708_v21 }
 0x483   : > { %v525_v56 = vpop.permute.xlu1 %524  ;;  %v527_v63 = vpop.permute.xlu0 %526 }
 0x484   : > { %v529_v58 = vmul.f32 %v525_v56, %v520_v48 }
 0x486   : > { %v530_v59 = vadd.f32 %v529_v58, %v528_v57  ;;  %v1090_v57 = vld [vmem:[%s1689_s18 + $0x18] sm:$0xff]  ;;  %v765_v58 = vld [vmem:[%s764_s9] sm:$0xff] }
 0x488   : > { %1323 = vtanh.f32 %v530_v59 }
 0x48a   : > { %v1322_v60 = vpop.eup %1321 }
 0x48b   : > { %v543_v61 = vmul.f32 %v1322_v60, %v538_v54 }
 0x48d   : > { %547 = vrot.lane.b32.xlu1 %v543_v61, %s1467_s20 }
 0x492   : > { %v1324_v62 = vpop.eup %1323 }
 0x493   : > { %v532_v0 = vmul.f32 %v1324_v62, %v527_v63 }
 0x495   : > { %1075 = vst.msk [vmem:[%s1714_s3 + $0x8] sm:$0xff] %vm412_vm8, %v532_v0 }
 0x4ff   : > { %v548_v17 = vpop.permute.xlu1 %547 }
 0x500   : > { %551 = vst.msk [vmem:[%s550_s26] sm:$0xff] %vm419_vm9, %v548_v17  ;;  %v552_v18 = vsel %vm412_vm8, %v532_v0, %v548_v17 }
 0x501   : > { %1077 = vmatmul.mubr.msk.f32.vlgmr.msra.gmra.mrb[2].mxu0 %vm292_vm7, %v552_v18 }
 0x5d4   : > { %v626_v21 = vpop.f32.mrb[2].mxu0 }
 0x5d5   : > { %v635_v22 = vadd.f32 %v1080_v19, %v626_v21  ;;  %v628_v23 = vpop.f32.mrb[3].mxu0 }
 0x5d6   : > { %v636_v24 = vadd.f32 %v634_v20, %v628_v23 }
 0x5d7   : > { %v1081_v25 = vmul.f32 -1.442695, %v635_v22 }
 0x5d8   : > { %v1082_v26 = vmul.f32 -1.442695, %v636_v24 }
 0x5d9   : > { %1325 = vpow2.f32 %v1081_v25 }
 0x5da   : > { %1327 = vpow2.f32 %v1082_v26 }
 0x5db   : > { %1329 = vtanh.f32 %v636_v24 }
 0x5e3   : > { %v1326_v27 = vpop.eup %1325 }
 0x5e4   : > { %v1328_v28 = vpop.eup %1327  ;;  %v645_v29 = vadd.f32 1.0, %v1326_v27 }
 0x5e5   : > { %v646_v30 = vadd.f32 1.0, %v1328_v28  ;;  %v1330_v31 = vpop.eup %1329 }
 0x5e7   : > { %1331 = vrcp.f32 %v646_v30 }
 0x5e8   : > { %1333 = vrcp.f32 %v645_v29 }
 0x5e9   : > { %1335 = vtanh.f32 %v635_v22 }
 0x5f1   : > { %v1332_v35 = vpop.eup %1331 }
 0x5f2   : > { %v652_v32 = vsel %vm1600_vm6, %v1330_v31, %v1332_v35  ;;  %v1334_v41 = vpop.eup %1333 }
 0x5f3   : > { %666 = vrot.lane.b32.xlu1 %v652_v32, %s1469_s21  ;;  %664 = vrot.lane.b32.xlu0 %v652_v32, %s1468_s1  ;;  %v1336_v33 = vpop.eup %1335 }
 0x5f4   : > { %v651_v42 = vsel %vm1596_vm3, %v1336_v33, %v1334_v41 }
 0x5f7   : > { %653 = vrot.lane.b32.xlu1 %v651_v42, %s1468_s1  ;;  %668 = vrot.lane.b32.xlu0 %v652_v32, %s1467_s20 }
 0x5fb   : > { %657 = vrot.lane.b32.xlu1 %v651_v42, %s1467_s20  ;;  %655 = vrot.lane.b32.xlu0 %v651_v42, %s1469_s21 }
 0x665   : > { %v667_v37 = vpop.permute.xlu1 %666  ;;  %v665_v38 = vpop.permute.xlu0 %664 }
 0x666   : > { %v671_v39 = vmul.f32 %v667_v37, %v652_v32  ;;  %v670_v43 = vmul.f32 %v665_v38, %v541_v53 }
 0x668   : > { %v672_v40 = vadd.f32 %v671_v39, %v670_v43 }
 0x669   : > { %v669_v44 = vpop.permute.xlu0 %668  ;;  %v654_v45 = vpop.permute.xlu1 %653 }
 0x66a   : > { %1337 = vtanh.f32 %v672_v40  ;;  %v659_v47 = vmul.f32 %v654_v45, %v530_v59  ;;  %v824_v45 = vld [vmem:[%s1857_s4 + $0x8] sm:$0xff] (%p281_p2) }
 0x66d   : > { %v656_v46 = vpop.permute.xlu0 %655  ;;  %v658_v54 = vpop.permute.xlu1 %657 }
 0x66e   : > { %v660_v48 = vmul.f32 %v656_v46, %v651_v42  ;;  %v825_v46 = vld [vmem:[%s1857_s4 + $0x10] sm:$0xff] (%p281_p2) }
 0x670   : > { %v661_v49 = vadd.f32 %v660_v48, %v659_v47  ;;  %v826_v48 = vld [vmem:[%s1857_s4 + $0x18] sm:$0xff] (%p281_p2) }
 0x672   : > { %1339 = vtanh.f32 %v661_v49 }
 0x674   : > { %v1338_v50 = vpop.eup %1337 }
 0x675   : > { %v674_v51 = vmul.f32 %v1338_v50, %v669_v44  ;;  %v823_v44 = vld [vmem:[%s1857_s4] sm:$0xff] (%p281_p2) }
 0x676   :  { %v1223_v47 = vpack.c.bf16 (%p281_p2), %v824_v45, %v823_v44 }
 0x677   : > { %678 = vrot.lane.b32.xlu0 %v674_v51, %s1467_s20 }
 0x678   :  { %1224 = vmatprep.subr.bf16.mxu0 (%p281_p2), %v1223_v47  ;;  %1241 = vmatprep.subr.bf16.mxu1 (%p281_p2), %v1223_v47 }
 0x679   :  { %1226 = vmatpush3.bf16.msra.mxu0 (%p281_p2), %v1223_v47 }
 0x67c   : > { %v1340_v52 = vpop.eup %1339 }
 0x67d   : > { %v663_v53 = vmul.f32 %v1340_v52, %v658_v54 }
 0x67f   : > { %1085 = vst.msk [vmem:[%s1714_s3 + $0x10] sm:$0xff] %vm412_vm8, %v663_v53 }
 0x6e9   : > { %v679_v55 = vpop.permute.xlu0 %678 }
 0x6ea   : > { %682 = vst.msk [vmem:[%s681_s30] sm:$0xff] %vm419_vm9, %v679_v55  ;;  %v683_v56 = vsel %vm412_vm8, %v663_v53, %v679_v55 }
 0x6eb   : > { %1087 = vmatmul.mubr.msk.f32.vlgmr.msra.gmra.mrb[2].mxu1 %vm292_vm7, %v683_v56 }
 0x6ec   :  { %1245 = vmatpush3.bf16.msra.mxu1 (%p281_p2), %v1223_v47 }
 0x7be   : > { %v757_v59 = vpop.f32.mrb[2].mxu1 }
 0x7bf   : > { %v766_v60 = vadd.f32 %v1090_v57, %v757_v59  ;;  %v759_v61 = vpop.f32.mrb[3].mxu1 }
 0x7c0   : > { %v767_v62 = vadd.f32 %v765_v58, %v759_v61 }
 0x7c1   : > { %v1091_v63 = vmul.f32 -1.442695, %v766_v60 }
 0x7c2   : > { %v1092_v0 = vmul.f32 -1.442695, %v767_v62 }
 0x7c3   : > { %1341 = vpow2.f32 %v1091_v63 }
 0x7c4   : > { %1343 = vpow2.f32 %v1092_v0 }
 0x7c5   : > { %1345 = vtanh.f32 %v767_v62 }
 0x7cd   : > { %v1342_v17 = vpop.eup %1341 }
 0x7ce   : > { %v1344_v18 = vpop.eup %1343  ;;  %v776_v19 = vadd.f32 1.0, %v1342_v17 }
 0x7cf   : > { %v777_v20 = vadd.f32 1.0, %v1344_v18  ;;  %v1346_v21 = vpop.eup %1345 }
 0x7d1   : > { %1347 = vrcp.f32 %v777_v20 }
 0x7d2   : > { %1349 = vrcp.f32 %v776_v19 }
 0x7d3   : > { %1351 = vtanh.f32 %v766_v60 }
 0x7db   : > { %v1348_v22 = vpop.eup %1347 }
 0x7dc   : > { %v783_v23 = vsel %vm1600_vm6, %v1346_v21, %v1348_v22  ;;  %v1350_v24 = vpop.eup %1349 }
 0x7dd   : > { %797 = vrot.lane.b32.xlu0 %v783_v23, %s1469_s21  ;;  %795 = vrot.lane.b32.xlu1 %v783_v23, %s1468_s1  ;;  %v1352_v25 = vpop.eup %1351 }
 0x7de   : > { %v782_v26 = vsel %vm1596_vm3, %v1352_v25, %v1350_v24 }
 0x7e1   : > { %784 = vrot.lane.b32.xlu0 %v782_v26, %s1468_s1  ;;  %799 = vrot.lane.b32.xlu1 %v783_v23, %s1467_s20 }
 0x7e5   : > { %788 = vrot.lane.b32.xlu0 %v782_v26, %s1467_s20  ;;  %786 = vrot.lane.b32.xlu1 %v782_v26, %s1469_s21 }
 0x84f   : > { %v798_v27 = vpop.permute.xlu0 %797  ;;  %v796_v28 = vpop.permute.xlu1 %795 }
 0x850   : > { %v802_v29 = vmul.f32 %v798_v27, %v783_v23  ;;  %v801_v30 = vmul.f32 %v796_v28, %v672_v40 }
 0x852   : > { %v803_v27 = vadd.f32 %v802_v29, %v801_v30  }
 0x853   : > { %v800_v31 = vpop.permute.xlu1 %799  ;;  %v785_v35 = vpop.permute.xlu0 %784 }
 0x854   : > { %1353 = vtanh.f32 %v803_v27  ;;  %v790_v41 = vmul.f32 %v785_v35, %v661_v49  ;;  %v1227_v49 = vpack.c.bf16 (%p281_p2), %v826_v48, %v825_v46 }
 0x856   :  { %1228 = vmatprep.subr.bf16.mxu0 (%p281_p2), %v1227_v49  ;;  %1242 = vmatprep.subr.bf16.mxu1 (%p281_p2), %v1227_v49 }
 0x857   : > { %v787_v32 = vpop.permute.xlu1 %786  ;;  %v789_v39 = vpop.permute.xlu0 %788  ;;  %1230 = vmatpush3.bf16.msra.mxu0 (%p281_p2), %v1227_v49  ;;  %1246 = vmatpush3.bf16.msra.mxu1 (%p281_p2), %v1227_v49 }
 0x858   : > { %v791_v33 = vmul.f32 %v787_v32, %v782_v26  ;;  %1232 = vmatprep.subr.bf16.mxu0 (%p281_p2), %v1231_v5  ;;  %1243 = vmatprep.subr.bf16.mxu1 (%p281_p2), %v1231_v5 }
 0x85a   : > { %v792_v28 = vadd.f32 %v791_v33, %v790_v41  }
 0x85b   :  { %1234 = vmatpush3.bf16.msra.mxu0 (%p281_p2), %v1231_v5  ;;  %1247 = vmatpush3.bf16.msra.mxu1 (%p281_p2), %v1231_v5 }
 0x85c   : > { %1355 = vtanh.f32 %v792_v28  ;;  %1236 = vmatprep.subr.bf16.mxu0 (%p281_p2), %v1235_v8  ;;  %1244 = vmatprep.subr.bf16.mxu1 (%p281_p2), %v1235_v8 }
 0x85e   : > { %v1354_v42 = vpop.eup %1353 }
 0x85f   : > { %v805_v37 = vmul.f32 %v1354_v42, %v800_v31  ;;  %1238 = vmatpush3.bf16.msra.mxu0 (%p281_p2), %v1235_v8  ;;  %1248 = vmatpush3.bf16.msra.mxu1 (%p281_p2), %v1235_v8 }
 0x861   : > { %809 = vrot.lane.b32.xlu1 %v805_v37, %s1467_s20 }
 0x866   : > { %v1356_v38 = vpop.eup %1355 }
 0x867   : > { %v794_v43 = vmul.f32 %v1356_v38, %v789_v39 }
 0x869   : > { %1095 = vst.msk [vmem:[%s1714_s3 + $0x18] sm:$0xff] %vm412_vm8, %v794_v43 }
 0x8ce   :  { %283 = sbr.rel (!%p281_p2) target bundleno = 279 (0x117), region = 75 }
 0x8d3   : > { %v810_v40 = vpop.permute.xlu1 %809 }
 0x8d4   : > { %813 = vst.msk [vmem:[%s812_s10] sm:$0xff] %vm419_vm9, %v810_v40  ;;  %v814_v29 = vsel %vm412_vm8, %v794_v43, %v810_v40  }
 0x8db   :  { %v815_v3 = vld [vmem:[#allocation4] sm:$0xff]  ;;  %v816_v9 = vld [vmem:[#allocation4 + $0x8] sm:$0xff]  ;;  %v817_v11 = vld [vmem:[#allocation4 + $0x10] sm:$0xff] }
 0x8dc   :  { %v819_v4 = vld [vmem:[#allocation4 + $0x20] sm:$0xff]  ;;  %1143 = vmatprep.mubr.msk.f32.mxu0 %vm292_vm7, %v815_v3  ;;  %v820_v10 = vld [vmem:[#allocation4 + $0x28] sm:$0xff]  ;;  %v821_v12 = vld [vmem:[#allocation4 + $0x30] sm:$0xff] }
 0x8dd   :  { %1149 = vmatprep.mubr.msk.f32.mxu1 %vm292_vm7, %v819_v4  ;;  %1144 = vmatmul.mubr.msk.f32.vlgmr.msra.gmra.mrb[0].mxu0 %vm292_vm7, %v816_v9  ;;  %v818_v13 = vld [vmem:[#allocation4 + $0x18] sm:$0xff] }
 0x8de   :  { %1150 = vmatmul.mubr.msk.f32.vlgmr.msra.gmra.mrb[0].mxu1 %vm292_vm7, %v820_v10  ;;  %1146 = vmatprep.mubr.msk.f32.mxu0 %vm292_vm7, %v817_v11  ;;  %v822_v14 = vld [vmem:[#allocation4 + $0x38] sm:$0xff] }
 0x8df   :  { %1152 = vmatprep.mubr.msk.f32.mxu1 %vm292_vm7, %v821_v12 }
 0x8e1   :  { %1147 = vmatmul.mubr.msk.f32.gmra.mrb[2].mxu0 %vm292_vm7, %v818_v13 }
 0x8e2   :  { %1153 = vmatmul.mubr.msk.f32.gmra.mrb[2].mxu1 %vm292_vm7, %v822_v14 }
 0x9b0   :  { %v1145_v16 = vpop.f32.mrb[0].mxu0 }
 0x9b1   :  { %v1151_v34 = vpop.f32.mrb[0].mxu1  ;;  %v935_v36 = vadd.f32 %v1145_v16, %v1096_v15  ;;  %v929_v51 = vpop.f32.mrb[1].mxu0 }
 0x9b2   :  { %v955_v50 = vadd.f32 %v1151_v34, %v1096_v15  ;;  %v949_v52 = vpop.f32.mrb[1].mxu1  ;;  %v930_v54 = vadd.f32 %v1096_v15, %v929_v51 }
 0x9b3   :  { %v950_v53 = vadd.f32 %v1096_v15, %v949_v52  ;;  %969 = vst [vmem:[#allocation10 + $0x8] sm:$0xff] %v935_v36 }
 0x9b4   :  { %973 = vst [vmem:[#allocation10 + $0x28] sm:$0xff] %v955_v50  ;;  %968 = vst [vmem:[#allocation10] sm:$0xff] %v930_v54  ;;  %v1148_v55 = vpop.f32.mrb[2].mxu0 }
 0x9b5   :  { %972 = vst [vmem:[#allocation10 + $0x20] sm:$0xff] %v950_v53  ;;  %v1154_v56 = vpop.f32.mrb[2].mxu1  ;;  %v945_v57 = vadd.f32 %v1148_v55, %v1096_v15  ;;  %v939_v59 = vpop.f32.mrb[3].mxu0 }
 0x9b6   :  { %v965_v58 = vadd.f32 %v1154_v56, %v1096_v15  ;;  %v959_v60 = vpop.f32.mrb[3].mxu1  ;;  %v940_v61 = vadd.f32 %v1096_v15, %v939_v59 }
 0x9b7   :  { %v960_v62 = vadd.f32 %v1096_v15, %v959_v60  ;;  %971 = vst [vmem:[#allocation10 + $0x18] sm:$0xff] %v945_v57 }
 0x9b8   :  { %975 = vst [vmem:[#allocation10 + $0x38] sm:$0xff] %v965_v58  ;;  %970 = vst [vmem:[#allocation10 + $0x10] sm:$0xff] %v940_v61 }
 0x9b9   :  { %974 = vst [vmem:[#allocation10 + $0x30] sm:$0xff] %v960_v62 }
 0x9ba   :  { %1412 = shalt.err (!%p1409_p7)
}
 0x9bb   :  { %s1413_s28 = scalar_lea.hbm %s1859_s6, 1024 }
 0x9bc   :  { %p1414_p8 = scmp.ne.s32.totalorder %s1859_s6, %s1413_s28  ;;  %p1417_p9 = scmp.lt.u32.totalorder %s1413_s28, %s1859_s6 }
 0x9be   :  { %p1419_p10 = pnand %p1417_p9, %p1414_p8 }
 0x9c0   :  { %1422 = shalt.err (!%p1419_p10)
}
 0x9c1   :  { %s1471_s9 = smov 128   ;;  %s1472_s10 = smov 8  }
 0x9c2   :  { %987 = dma.vmem_to_hbm [thread:$0]  %s982_s25, 1024, %s1859_s6, [#allocation7], %s1471_s9, %s1471_s9, %s1472_s10  }
 0x9c3   :  { %1443 = dma.done.wait [#allocation7], 1024  }
 0x9c4   :  { %1444 = vsyncadd [#allocation7], 4294966272 }
 0x9c5   :  { %991 = vsyncpa [#allocation6], 1 }
 0x9c6   :  { %992 = vsyncpa [#allocation9], 1 }
 0x9c7   :  { %993 = vsyncpa [#allocation7], 1 }

</bundles_post_ra>
